<compile_context>
chip_gen: v5e
topology: v5e:2x2
jax: 0.10.0
libtpu: 0.0.40
codegen_flags: <defaults>
</compile_context>

<pallas_src>
import functools
import math

import jax
import jax.numpy as jnp
from jax.experimental import pallas as pl
from jax.experimental.pallas import tpu as pltpu

# ----------------------- small, module-consistent shapes -----------------------
B = 2            # image batch (becomes the MHA "sequence length": batch_first=False)
CIN = 3          # RGB input channels
H = W = 16       # small spatial size
HW = H * W       # 256 -> MHA "batch" size
F = 96           # stand-in for mobilenet_v3_small fc_in_features (=576); divisible by 3
NUM_HEADS = 3    # nn.MultiheadAttention(fc_in_features, num_heads=3)
HEAD_DIM = F // NUM_HEADS

_VMEM = pl.BlockSpec(memory_space=pltpu.MemorySpace.VMEM)


def _matmul_nt(a, b):
    """a @ b.T with fp32 accumulation (PyTorch nn.Linear convention)."""
    return jax.lax.dot_general(
        a, b, (((1,), (1,)), ((), ())), preferred_element_type=jnp.float32)


# -------------------- fused feature extractor (both branches) ------------------
def _features_kernel(x_ref, w_ref, b_ref, o_ref):
    # x_ref: (2B, CIN, HW)   w_ref: (F, CIN)   b_ref: (F, 1)   o_ref: (2B, F, HW)
    # The K=CIN=3 contraction runs on the VPU as 3 broadcast FMAs.
    w0 = w_ref[:, 0:1]
    w1 = w_ref[:, 1:2]
    w2 = w_ref[:, 2:3]
    bias = b_ref[...]
    for n in range(x_ref.shape[0]):                      # static unroll over 2B samples
        x_n = x_ref[n]                                   # (CIN, HW)
        y = w0 * x_n[0:1, :] + w1 * x_n[1:2, :] + w2 * x_n[2:3, :] + bias   # (F, HW)
        # hardswish (final activation of the mobilenet_v3 feature stack)
        o_ref[n] = y * jnp.clip(y + 3.0, 0.0, 6.0) * (1.0 / 6.0)


def features(x_all, conv_w, conv_b):
    n = x_all.shape[0]
    return pl.pallas_call(
        _features_kernel,
        out_shape=jax.ShapeDtypeStruct((n, F, HW), jnp.float32),
        in_specs=[_VMEM, _VMEM, _VMEM],
        out_specs=_VMEM,
    )(x_all, conv_w, conv_b)


# ------------- fused self-attention (both branches) + abs-diff head ------------
def _attn_head_kernel(xa_ref, wi_ref, bi_ref, wo_ref, bo_ref, cw_ref, cb_ref,
                      out_ref, qkv_ref, att0_ref):
    # xa_ref : (2*B*HW, F)  rows [br*B*HW + tok*HW : +HW) = branch br, seq token tok
    # wi_ref : (3F, F)   bi_ref: (1, 3F)    combined in-projection
    # wo_ref : (F, F)    bo_ref: (1, F)     out-projection
    # cw_ref : (1, F)    cb_ref: (1, 1)     classifier Linear(F, 1)
    # out_ref: (B, 1)
    # qkv_ref : VMEM scratch (B*HW, 3F) - per-branch QKV staging (reused across branches)
    # att0_ref: VMEM scratch (B*HW, F)  - branch-0 attention output, consumed by branch 1
    scale = 1.0 / math.sqrt(HEAD_DIM)
    LN = B * HW
    d_rows = []
    for br in range(2):                                   # the two siamese branches
        base = br * LN
        # fused in-projection: one (B*HW, F) @ (F, 3F) matmul (M = 512) per branch
        qkv_ref[...] = _matmul_nt(xa_ref[base:base + LN, :], wi_ref[...]) + bi_ref[...]
        for tok in range(B):                              # query "sequence" position
            rq = tok * HW
            ctx_heads = []
            for h in range(NUM_HEADS):
                cq = h * HEAD_DIM
                ck = F + cq
                cv = 2 * F + cq
                q = qkv_ref[rq:rq + HW, cq:cq + HEAD_DIM]                 # (HW, Dh)
                # attention logits over the (tiny) key axis j = 0..B-1
                logits = [jnp.sum(q * qkv_ref[j * HW:(j + 1) * HW, ck:ck + HEAD_DIM],
                                  axis=-1, keepdims=True) * scale         # (HW, 1)
                          for j in range(B)]
                m = functools.reduce(jnp.maximum, logits)
                es = [jnp.exp(lg - m) for lg in logits]
                inv = pl.reciprocal(functools.reduce(lambda a, c: a + c, es),
                                    approx=True)                          # hoisted, EUP
                acc = jnp.zeros((HW, HEAD_DIM), jnp.float32)
                for j in range(B):
                    v = qkv_ref[j * HW:(j + 1) * HW, cv:cv + HEAD_DIM]
                    acc = acc + (es[j] * inv) * v                         # (HW, Dh)
                ctx_heads.append(acc)
            ctx = jnp.concatenate(ctx_heads, axis=-1)                     # (HW, F)
            # single out-projection per (branch, token): (HW,F)@(F,F) on the MXU
            att = _matmul_nt(ctx, wo_ref[...]) + bo_ref[...]              # (HW, F)
            if br == 0:
                att0_ref[rq:rq + HW, :] = att
            else:
                o1 = att0_ref[rq:rq + HW, :]
                # torch: diff = mean(|o1 - o2|, dim=1); ReLU dropped (mean(|.|) >= 0)
                d_rows.append(jnp.mean(jnp.abs(o1 - att), axis=0, keepdims=True))
    diff = jnp.concatenate(d_rows, axis=0)                                # (B, F)
    # classifier Linear(F, 1) as VPU multiply + cross-lane reduce (avoids a 1-column
    # MXU matmul, which would be pure drain overhead)
    out_ref[...] = jnp.sum(diff * cw_ref[...], axis=-1, keepdims=True) + cb_ref[...]


def attention_and_head(xa_all, p):
    return pl.pallas_call(
        _attn_head_kernel,
        out_shape=jax.ShapeDtypeStruct((B, 1), jnp.float32),
        in_specs=[_VMEM] * 7,
        out_specs=_VMEM,
        scratch_shapes=[pltpu.VMEM((B * HW, 3 * F), jnp.float32),
                        pltpu.VMEM((B * HW, F), jnp.float32)],
    )(xa_all, p["in_proj_w"], p["in_proj_b"], p["out_proj_w"], p["out_proj_b"],
      p["cls_w"], p["cls_b"])


# --------------------------------- full model ----------------------------------
def siamese_forward(x1, x2, p):
    b = x1.shape[0]
    # stack the two branches so the feature weights are loaded once for both
    x_all = jnp.concatenate([x1, x2], axis=0).reshape(2 * b, CIN, HW)
    feat = features(x_all, p["conv_w"], p["conv_b"])          # (2b, F, HW), NCHW order
    # PyTorch `x.view(b, w*h, f)`: raw row-major reshape of NCHW memory, done ONCE here
    # (single XLA relayout) for both branches.  Rows are grouped
    # [branch, seq-token (=image index), spatial token].
    xa_all = feat.reshape(2 * b * HW, F)
    # torch `.squeeze()` after attention is a no-op for these shapes (no size-1 dims).
    return attention_and_head(xa_all, p)                      # (b, 1)


# ------------------------------------ main --------------------------------------
if __name__ == "__main__":
    key = jax.random.PRNGKey(0)
    ks = jax.random.split(key, 9)
    params = {
        "conv_w":     jax.random.normal(ks[0], (F, CIN), jnp.float32) * 0.10,
        "conv_b":     jax.random.normal(ks[1], (F, 1), jnp.float32) * 0.10,
        "in_proj_w":  jax.random.normal(ks[2], (3 * F, F), jnp.float32) * 0.05,
        "in_proj_b":  jax.random.normal(ks[3], (1, 3 * F), jnp.float32) * 0.05,
        "out_proj_w": jax.random.normal(ks[4], (F, F), jnp.float32) * 0.05,
        "out_proj_b": jax.random.normal(ks[5], (1, F), jnp.float32) * 0.05,
        "cls_w":      jax.random.normal(ks[6], (1, F), jnp.float32) * 0.10,
        "cls_b":      jax.random.normal(ks[7], (1, 1), jnp.float32) * 0.10,
    }
    x1 = jax.random.normal(ks[8], (B, CIN, H, W), jnp.float32)
    x2 = jax.random.normal(jax.random.PRNGKey(1), (B, CIN, H, W), jnp.float32)

    out = siamese_forward(x1, x2, params)
    out = jax.block_until_ready(out)
    assert out.shape == (B, 1), out.shape
    assert not bool(jnp.any(jnp.isnan(out)))
    print("KERNEL_OK")
</pallas_src>

<mosaic_0001>
module attributes {stable_mosaic.version = 11 : i64} {
  func.func @_features_kernel(%arg0: memref<4x3x256xf32, #tpu.memory_space<vmem>>, %arg1: memref<96x3xf32, #tpu.memory_space<vmem>>, %arg2: memref<96x1xf32, #tpu.memory_space<vmem>>, %arg3: memref<4x96x256xf32, #tpu.memory_space<vmem>>) attributes {dimension_semantics = [], scalar_prefetch = 0 : i64, scratch_operands = 0 : i64, tpu.core_type = #tpu.core_type<tc>} {
    %c0 = arith.constant 0 : index
    %c0_0 = arith.constant 0 : index
    %0 = vector.load %arg1[%c0, %c0_0] : memref<96x3xf32, #tpu.memory_space<vmem>>, vector<96x1xf32>
    %c0_1 = arith.constant 0 : index
    %c1 = arith.constant 1 : index
    %1 = vector.load %arg1[%c0_1, %c1] : memref<96x3xf32, #tpu.memory_space<vmem>>, vector<96x1xf32>
    %c0_2 = arith.constant 0 : index
    %c2 = arith.constant 2 : index
    %2 = vector.load %arg1[%c0_2, %c2] : memref<96x3xf32, #tpu.memory_space<vmem>>, vector<96x1xf32>
    %c0_3 = arith.constant 0 : index
    %c0_4 = arith.constant 0 : index
    %3 = vector.load %arg2[%c0_3, %c0_4] : memref<96x1xf32, #tpu.memory_space<vmem>>, vector<96x1xf32>
    %c0_5 = arith.constant 0 : index
    %c0_6 = arith.constant 0 : index
    %c0_7 = arith.constant 0 : index
    %4 = vector.load %arg0[%c0_5, %c0_6, %c0_7] : memref<4x3x256xf32, #tpu.memory_space<vmem>>, vector<1x3x256xf32>
    %5 = vector.shape_cast %4 : vector<1x3x256xf32> to vector<3x256xf32>
    %6 = vector.extract_strided_slice %5 {offsets = [0, 0], sizes = [1, 256], strides = [1, 1]} : vector<3x256xf32> to vector<1x256xf32>
    %7 = vector.broadcast %0 : vector<96x1xf32> to vector<96x256xf32>
    %8 = vector.broadcast %6 : vector<1x256xf32> to vector<96x256xf32>
    %9 = arith.mulf %7, %8 : vector<96x256xf32>
    %10 = vector.extract_strided_slice %5 {offsets = [1, 0], sizes = [1, 256], strides = [1, 1]} : vector<3x256xf32> to vector<1x256xf32>
    %11 = vector.broadcast %1 : vector<96x1xf32> to vector<96x256xf32>
    %12 = vector.broadcast %10 : vector<1x256xf32> to vector<96x256xf32>
    %13 = arith.mulf %11, %12 : vector<96x256xf32>
    %14 = arith.addf %9, %13 : vector<96x256xf32>
    %15 = vector.extract_strided_slice %5 {offsets = [2, 0], sizes = [1, 256], strides = [1, 1]} : vector<3x256xf32> to vector<1x256xf32>
    %16 = vector.broadcast %2 : vector<96x1xf32> to vector<96x256xf32>
    %17 = vector.broadcast %15 : vector<1x256xf32> to vector<96x256xf32>
    %18 = arith.mulf %16, %17 : vector<96x256xf32>
    %19 = arith.addf %14, %18 : vector<96x256xf32>
    %20 = vector.broadcast %3 : vector<96x1xf32> to vector<96x256xf32>
    %21 = arith.addf %19, %20 : vector<96x256xf32>
    %cst = arith.constant 3.000000e+00 : f32
    %22 = vector.broadcast %cst : f32 to vector<96x256xf32>
    %23 = arith.addf %21, %22 : vector<96x256xf32>
    %cst_8 = arith.constant 0.000000e+00 : f32
    %cst_9 = arith.constant 6.000000e+00 : f32
    %24 = vector.broadcast %cst_8 : f32 to vector<96x256xf32>
    %25 = arith.maximumf %24, %23 : vector<96x256xf32>
    %26 = vector.broadcast %cst_9 : f32 to vector<96x256xf32>
    %27 = arith.minimumf %26, %25 : vector<96x256xf32>
    %28 = arith.mulf %21, %27 : vector<96x256xf32>
    %cst_10 = arith.constant 0.166666672 : f32
    %29 = vector.broadcast %cst_10 : f32 to vector<96x256xf32>
    %30 = arith.mulf %28, %29 : vector<96x256xf32>
    %c0_11 = arith.constant 0 : index
    %c0_12 = arith.constant 0 : index
    %c0_13 = arith.constant 0 : index
    %31 = vector.load %arg3[%c0_11, %c0_12, %c0_13] : memref<4x96x256xf32, #tpu.memory_space<vmem>>, vector<1x96x256xf32>
    %32 = vector.shape_cast %31 : vector<1x96x256xf32> to vector<96x256xf32>
    %33 = vector.shape_cast %30 : vector<96x256xf32> to vector<1x96x256xf32>
    tpu.vector_store %arg3[%c0_11, %c0_12, %c0_13], %33 {strides = array<i32>} : memref<4x96x256xf32, #tpu.memory_space<vmem>>, vector<1x96x256xf32>,
    %c1_14 = arith.constant 1 : index
    %c0_15 = arith.constant 0 : index
    %c0_16 = arith.constant 0 : index
    %34 = vector.load %arg0[%c1_14, %c0_15, %c0_16] : memref<4x3x256xf32, #tpu.memory_space<vmem>>, vector<1x3x256xf32>
    %35 = vector.shape_cast %34 : vector<1x3x256xf32> to vector<3x256xf32>
    %36 = vector.extract_strided_slice %35 {offsets = [0, 0], sizes = [1, 256], strides = [1, 1]} : vector<3x256xf32> to vector<1x256xf32>
    %37 = vector.broadcast %0 : vector<96x1xf32> to vector<96x256xf32>
    %38 = vector.broadcast %36 : vector<1x256xf32> to vector<96x256xf32>
    %39 = arith.mulf %37, %38 : vector<96x256xf32>
    %40 = vector.extract_strided_slice %35 {offsets = [1, 0], sizes = [1, 256], strides = [1, 1]} : vector<3x256xf32> to vector<1x256xf32>
    %41 = vector.broadcast %1 : vector<96x1xf32> to vector<96x256xf32>
    %42 = vector.broadcast %40 : vector<1x256xf32> to vector<96x256xf32>
    %43 = arith.mulf %41, %42 : vector<96x256xf32>
    %44 = arith.addf %39, %43 : vector<96x256xf32>
    %45 = vector.extract_strided_slice %35 {offsets = [2, 0], sizes = [1, 256], strides = [1, 1]} : vector<3x256xf32> to vector<1x256xf32>
    %46 = vector.broadcast %2 : vector<96x1xf32> to vector<96x256xf32>
    %47 = vector.broadcast %45 : vector<1x256xf32> to vector<96x256xf32>
    %48 = arith.mulf %46, %47 : vector<96x256xf32>
    %49 = arith.addf %44, %48 : vector<96x256xf32>
    %50 = vector.broadcast %3 : vector<96x1xf32> to vector<96x256xf32>
    %51 = arith.addf %49, %50 : vector<96x256xf32>
    %cst_17 = arith.constant 3.000000e+00 : f32
    %52 = vector.broadcast %cst_17 : f32 to vector<96x256xf32>
    %53 = arith.addf %51, %52 : vector<96x256xf32>
    %cst_18 = arith.constant 0.000000e+00 : f32
    %cst_19 = arith.constant 6.000000e+00 : f32
    %54 = vector.broadcast %cst_18 : f32 to vector<96x256xf32>
    %55 = arith.maximumf %54, %53 : vector<96x256xf32>
    %56 = vector.broadcast %cst_19 : f32 to vector<96x256xf32>
    %57 = arith.minimumf %56, %55 : vector<96x256xf32>
    %58 = arith.mulf %51, %57 : vector<96x256xf32>
    %cst_20 = arith.constant 0.166666672 : f32
    %59 = vector.broadcast %cst_20 : f32 to vector<96x256xf32>
    %60 = arith.mulf %58, %59 : vector<96x256xf32>
    %c1_21 = arith.constant 1 : index
    %c0_22 = arith.constant 0 : index
    %c0_23 = arith.constant 0 : index
    %61 = vector.load %arg3[%c1_21, %c0_22, %c0_23] : memref<4x96x256xf32, #tpu.memory_space<vmem>>, vector<1x96x256xf32>
    %62 = vector.shape_cast %61 : vector<1x96x256xf32> to vector<96x256xf32>
    %63 = vector.shape_cast %60 : vector<96x256xf32> to vector<1x96x256xf32>
    tpu.vector_store %arg3[%c1_21, %c0_22, %c0_23], %63 {strides = array<i32>} : memref<4x96x256xf32, #tpu.memory_space<vmem>>, vector<1x96x256xf32>,
    %c2_24 = arith.constant 2 : index
    %c0_25 = arith.constant 0 : index
    %c0_26 = arith.constant 0 : index
    %64 = vector.load %arg0[%c2_24, %c0_25, %c0_26] : memref<4x3x256xf32, #tpu.memory_space<vmem>>, vector<1x3x256xf32>
    %65 = vector.shape_cast %64 : vector<1x3x256xf32> to vector<3x256xf32>
    %66 = vector.extract_strided_slice %65 {offsets = [0, 0], sizes = [1, 256], strides = [1, 1]} : vector<3x256xf32> to vector<1x256xf32>
    %67 = vector.broadcast %0 : vector<96x1xf32> to vector<96x256xf32>
    %68 = vector.broadcast %66 : vector<1x256xf32> to vector<96x256xf32>
    %69 = arith.mulf %67, %68 : vector<96x256xf32>
    %70 = vector.extract_strided_slice %65 {offsets = [1, 0], sizes = [1, 256], strides = [1, 1]} : vector<3x256xf32> to vector<1x256xf32>
    %71 = vector.broadcast %1 : vector<96x1xf32> to vector<96x256xf32>
    %72 = vector.broadcast %70 : vector<1x256xf32> to vector<96x256xf32>
    %73 = arith.mulf %71, %72 : vector<96x256xf32>
    %74 = arith.addf %69, %73 : vector<96x256xf32>
    %75 = vector.extract_strided_slice %65 {offsets = [2, 0], sizes = [1, 256], strides = [1, 1]} : vector<3x256xf32> to vector<1x256xf32>
    %76 = vector.broadcast %2 : vector<96x1xf32> to vector<96x256xf32>
    %77 = vector.broadcast %75 : vector<1x256xf32> to vector<96x256xf32>
    %78 = arith.mulf %76, %77 : vector<96x256xf32>
    %79 = arith.addf %74, %78 : vector<96x256xf32>
    %80 = vector.broadcast %3 : vector<96x1xf32> to vector<96x256xf32>
    %81 = arith.addf %79, %80 : vector<96x256xf32>
    %cst_27 = arith.constant 3.000000e+00 : f32
    %82 = vector.broadcast %cst_27 : f32 to vector<96x256xf32>
    %83 = arith.addf %81, %82 : vector<96x256xf32>
    %cst_28 = arith.constant 0.000000e+00 : f32
    %cst_29 = arith.constant 6.000000e+00 : f32
    %84 = vector.broadcast %cst_28 : f32 to vector<96x256xf32>
    %85 = arith.maximumf %84, %83 : vector<96x256xf32>
    %86 = vector.broadcast %cst_29 : f32 to vector<96x256xf32>
    %87 = arith.minimumf %86, %85 : vector<96x256xf32>
    %88 = arith.mulf %81, %87 : vector<96x256xf32>
    %cst_30 = arith.constant 0.166666672 : f32
    %89 = vector.broadcast %cst_30 : f32 to vector<96x256xf32>
    %90 = arith.mulf %88, %89 : vector<96x256xf32>
    %c2_31 = arith.constant 2 : index
    %c0_32 = arith.constant 0 : index
    %c0_33 = arith.constant 0 : index
    %91 = vector.load %arg3[%c2_31, %c0_32, %c0_33] : memref<4x96x256xf32, #tpu.memory_space<vmem>>, vector<1x96x256xf32>
    %92 = vector.shape_cast %91 : vector<1x96x256xf32> to vector<96x256xf32>
    %93 = vector.shape_cast %90 : vector<96x256xf32> to vector<1x96x256xf32>
    tpu.vector_store %arg3[%c2_31, %c0_32, %c0_33], %93 {strides = array<i32>} : memref<4x96x256xf32, #tpu.memory_space<vmem>>, vector<1x96x256xf32>,
    %c3 = arith.constant 3 : index
    %c0_34 = arith.constant 0 : index
    %c0_35 = arith.constant 0 : index
    %94 = vector.load %arg0[%c3, %c0_34, %c0_35] : memref<4x3x256xf32, #tpu.memory_space<vmem>>, vector<1x3x256xf32>
    %95 = vector.shape_cast %94 : vector<1x3x256xf32> to vector<3x256xf32>
    %96 = vector.extract_strided_slice %95 {offsets = [0, 0], sizes = [1, 256], strides = [1, 1]} : vector<3x256xf32> to vector<1x256xf32>
    %97 = vector.broadcast %0 : vector<96x1xf32> to vector<96x256xf32>
    %98 = vector.broadcast %96 : vector<1x256xf32> to vector<96x256xf32>
    %99 = arith.mulf %97, %98 : vector<96x256xf32>
    %100 = vector.extract_strided_slice %95 {offsets = [1, 0], sizes = [1, 256], strides = [1, 1]} : vector<3x256xf32> to vector<1x256xf32>
    %101 = vector.broadcast %1 : vector<96x1xf32> to vector<96x256xf32>
    %102 = vector.broadcast %100 : vector<1x256xf32> to vector<96x256xf32>
    %103 = arith.mulf %101, %102 : vector<96x256xf32>
    %104 = arith.addf %99, %103 : vector<96x256xf32>
    %105 = vector.extract_strided_slice %95 {offsets = [2, 0], sizes = [1, 256], strides = [1, 1]} : vector<3x256xf32> to vector<1x256xf32>
    %106 = vector.broadcast %2 : vector<96x1xf32> to vector<96x256xf32>
    %107 = vector.broadcast %105 : vector<1x256xf32> to vector<96x256xf32>
    %108 = arith.mulf %106, %107 : vector<96x256xf32>
    %109 = arith.addf %104, %108 : vector<96x256xf32>
    %110 = vector.broadcast %3 : vector<96x1xf32> to vector<96x256xf32>
    %111 = arith.addf %109, %110 : vector<96x256xf32>
    %cst_36 = arith.constant 3.000000e+00 : f32
    %112 = vector.broadcast %cst_36 : f32 to vector<96x256xf32>
    %113 = arith.addf %111, %112 : vector<96x256xf32>
    %cst_37 = arith.constant 0.000000e+00 : f32
    %cst_38 = arith.constant 6.000000e+00 : f32
    %114 = vector.broadcast %cst_37 : f32 to vector<96x256xf32>
    %115 = arith.maximumf %114, %113 : vector<96x256xf32>
    %116 = vector.broadcast %cst_38 : f32 to vector<96x256xf32>
    %117 = arith.minimumf %116, %115 : vector<96x256xf32>
    %118 = arith.mulf %111, %117 : vector<96x256xf32>
    %cst_39 = arith.constant 0.166666672 : f32
    %119 = vector.broadcast %cst_39 : f32 to vector<96x256xf32>
    %120 = arith.mulf %118, %119 : vector<96x256xf32>
    %c3_40 = arith.constant 3 : index
    %c0_41 = arith.constant 0 : index
    %c0_42 = arith.constant 0 : index
    %121 = vector.load %arg3[%c3_40, %c0_41, %c0_42] : memref<4x96x256xf32, #tpu.memory_space<vmem>>, vector<1x96x256xf32>
    %122 = vector.shape_cast %121 : vector<1x96x256xf32> to vector<96x256xf32>
    %123 = vector.shape_cast %120 : vector<96x256xf32> to vector<1x96x256xf32>
    tpu.vector_store %arg3[%c3_40, %c0_41, %c0_42], %123 {strides = array<i32>} : memref<4x96x256xf32, #tpu.memory_space<vmem>>, vector<1x96x256xf32>,
    return
  }
}

</mosaic_0001>

<bundles_post_ra>
// kernel: tpu_custom_call.1
= control target key start
LH: loop header
LB: loop body
LE: loop exit
PB: predicated region body
PF: predicated region fallthrough
CT: control target
= control target key end

     0   :  { %v1557_v3 = vmov 1   ;;  %v1558_v4 = vmov 0   ;;  %s2805_s0 = inlined_call_operand.vmem [shape: f32[4,3,256], index: 0, kind: input, shape index: {}]   ;;  %s2806_s1 = inlined_call_operand.vmem [shape: f32[96,3], index: 1, kind: input, shape index: {}]   ;;  %s2807_s2 = inlined_call_operand.vmem [shape: f32[96,1], index: 2, kind: input, shape index: {}]   ;;  %s2808_s3 = inlined_call_operand.hbm [shape: f32[4,96,256], index: 3, kind: output, shape index: {}]  }
   0x1   :  { %v19_v0 = vld [vmem:[%s2806_s1 + $0x20] sm:$0xff]  ;;  %v17_v1 = vld [vmem:[%s2806_s1 + $0x10] sm:$0xff]  ;;  %1522 = vset.pattern.permute.xlu0 %v1557_v3  ;;  %1521 = vset.pattern.permute.xlu2 %v1558_v4 }
   0x2   :  { %v15_v2 = vld [vmem:[%s2806_s1] sm:$0xff]  ;;  %1520 = vset.pattern.permute.xlu1 %v1558_v4  ;;  %62 = vperm.xlu2 %1521, %v19_v0  }
   0x3   :  { %52 = vperm.xlu1 %1520, %v17_v1   ;;  %132 = vperm.xlu0 %1522, %v15_v2  }
   0x4   :  { %8 = vsyncpa [#allocation3], 0  ;;  %v20_v5 = vld [vmem:[%s2806_s1 + $0x28] sm:$0xff]  ;;  %v18_v6 = vld [vmem:[%s2806_s1 + $0x18] sm:$0xff]  ;;  %v1559_v12 = vmov 2   ;;  %s1499_s14 = sshll.u32 %s2808_s3, 4  ;;  %s1500_s14 = int_to_ptr.hbm [resolvable:$true] %s1499_s14 }
   0x5   :  { %v23_v7 = vld [vmem:[%s2806_s1 + $0x40] sm:$0xff]  ;;  %v22_v8 = vld [vmem:[%s2806_s1 + $0x38] sm:$0xff]  ;;  %v25_v10 = vld [vmem:[%s2806_s1 + $0x50] sm:$0xff]  ;;  %s1561_s15 = smov 256   ;;  %s1562_s16 = smov 16  }
   0x6   :  { %v26_v9 = vld [vmem:[%s2806_s1 + $0x58] sm:$0xff]  ;;  %v16_v11 = vld [vmem:[%s2806_s1 + $0x8] sm:$0xff]  ;;  %v21_v13 = vld [vmem:[%s2806_s1 + $0x30] sm:$0xff] }
   0x7   :  { %v24_v14 = vld [vmem:[%s2806_s1 + $0x48] sm:$0xff]  ;;  %v33_v18 = vld [vmem:[%s2807_s2 + $0x30] sm:$0xff]  ;;  %v27_v19 = vld [vmem:[%s2807_s2] sm:$0xff] }
   0x8   :  { %v28_v16 = vld [vmem:[%s2807_s2 + $0x8] sm:$0xff]  ;;  %v1639_v20 = vld [vmem:[%s2805_s0] sm:$0x77]  ;;  %v1649_v22 = vld [vmem:[%s2805_s0 + $0x10] sm:$0x77] }
   0x9   :  { %v1644_v21 = vld [vmem:[%s2805_s0 + $0x8] sm:$0x77]  ;;  %2827 = vst [vmem:[#allocation5_spill] sm:$0xff] %v1649_v22  ;;  %v1654_v23 = vld [vmem:[%s2805_s0 + $0x18] sm:$0x77]  ;;  %v101_v24 = vperm.slane %v1639_v20, 0 }
   0xa   :  { %67 = vperm.xlu2 %1521, %v20_v5   ;;  %2828 = vst [vmem:[#allocation6_spill] sm:$0xff] %v1654_v23  ;;  %v102_v25 = vperm.slane %v1639_v20, 4  ;;  %v566_v26 = vperm.slane %v1644_v21, 0  ;;  %v567_v27 = vperm.slane %v1644_v21, 4  ;;  %v876_v28 = vperm.slane %v1649_v22, 0  ;;  %v36_v33 = vld [vmem:[%s2807_s2 + $0x48] sm:$0xff] }
   0xb   :  { %57 = vperm.xlu1 %1520, %v18_v6   ;;  %152 = vperm.xlu0 %1522, %v20_v5   ;;  %v877_v29 = vperm.slane %v1649_v22, 4  ;;  %v1186_v30 = vperm.slane %v1654_v23, 0  ;;  %v1187_v31 = vperm.slane %v1654_v23, 4  ;;  %v30_v34 = vld [vmem:[%s2807_s2 + $0x18] sm:$0xff]  ;;  %v179_v35 = vperm.slane %v1639_v20, 1  ;;  %v29_v39 = vld [vmem:[%s2807_s2 + $0x10] sm:$0xff] }
   0xc   :  { %v180_v36 = vperm.slane %v1639_v20, 5  ;;  %v596_v37 = vperm.slane %v1644_v21, 1  ;;  %v597_v38 = vperm.slane %v1644_v21, 5  ;;  %v906_v40 = vperm.slane %v1649_v22, 1 }
   0xd   :  { %v907_v41 = vperm.slane %v1649_v22, 5  ;;  %v1216_v42 = vperm.slane %v1654_v23, 1  ;;  %v1217_v43 = vperm.slane %v1654_v23, 5  ;;  %v1681_v44 = vperm.slane %v101_v24, 0 }
   0xe   :  { %v1683_v45 = vperm.slane %v102_v25, 0  ;;  %v1685_v46 = vperm.slane %v566_v26, 0  ;;  %v1687_v47 = vperm.slane %v567_v27, 0  ;;  %v1690_v48 = vperm.slane %v876_v28, 0 }
   0xf   :  { %v1692_v49 = vperm.slane %v877_v29, 0  ;;  %v1694_v50 = vperm.slane %v1186_v30, 0  ;;  %v1696_v51 = vperm.slane %v1187_v31, 0  ;;  %v1698_v52 = vperm.slane %v179_v35, 1 }
  0x10   :  { %2829 = vst [vmem:[#allocation7_spill] sm:$0xff] %v1690_v48  ;;  %v1700_v53 = vperm.slane %v180_v36, 1  ;;  %v1702_v54 = vperm.slane %v596_v37, 1  ;;  %v1704_v55 = vperm.slane %v597_v38, 1  ;;  %v1706_v56 = vperm.slane %v906_v40, 1 }
  0x11   :  { %2830 = vst [vmem:[#allocation8_spill] sm:$0xff] %v1692_v49  ;;  %v1708_v57 = vperm.slane %v907_v41, 1  ;;  %v1710_v58 = vperm.slane %v1216_v42, 1  ;;  %v1712_v59 = vperm.slane %v1217_v43, 1 }
  0x12   :  { %82 = vperm.xlu2 %1521, %v23_v7   ;;  %2831 = vst [vmem:[#allocation9_spill] sm:$0xff] %v1694_v50 }
  0x13   :  { %77 = vperm.xlu1 %1520, %v22_v8   ;;  %164 = vperm.xlu0 %1522, %v23_v7   ;;  %2832 = vst [vmem:[#allocation10_spill] sm:$0xff] %v1696_v51 }
  0x1a   :  { %97 = vperm.xlu2 %1521, %v26_v9  }
  0x1b   :  { %92 = vperm.xlu1 %1520, %v25_v10   ;;  %176 = vperm.xlu0 %1522, %v26_v9  }
  0x22   :  { %1524 = vset.pattern.permute.xlu2 %v1557_v3 }
  0x23   :  { %1523 = vset.pattern.permute.xlu1 %v1557_v3  ;;  %1527 = vset.pattern.permute.xlu0 %v1559_v12 }
  0x24   :  { %140 = vperm.xlu2 %1524, %v17_v1   ;;  %136 = vperm.xlu1 %1523, %v16_v11  }
  0x25   :  { %242 = vperm.xlu0 %1527, %v17_v1  }
  0x2c   :  { %148 = vperm.xlu2 %1524, %v19_v0   ;;  %144 = vperm.xlu1 %1523, %v18_v6  }
  0x2d   :  { %262 = vperm.xlu0 %1527, %v22_v8  }
  0x34   :  { %160 = vperm.xlu2 %1524, %v22_v8   ;;  %156 = vperm.xlu1 %1523, %v21_v13  }
  0x35   :  { %274 = vperm.xlu0 %1527, %v25_v10  }
  0x3c   :  { %172 = vperm.xlu2 %1524, %v25_v10   ;;  %168 = vperm.xlu1 %1523, %v24_v14  }
  0x3d   :  { %1528 = vset.pattern.permute.xlu0 %v1558_v4 }
  0x3e   :  { %42 = vperm.xlu0 %1528, %v15_v2  }
  0x44   :  { %1526 = vset.pattern.permute.xlu2 %v1559_v12  ;;  %1525 = vset.pattern.permute.xlu1 %v1559_v12 }
  0x45   :  { %238 = vperm.xlu2 %1526, %v16_v11   ;;  %234 = vperm.xlu1 %1525, %v15_v2  }
  0x46   :  { %47 = vperm.xlu0 %1528, %v16_v11  }
  0x4d   :  { %250 = vperm.xlu2 %1526, %v19_v0   ;;  %246 = vperm.xlu1 %1525, %v18_v6  }
  0x4e   :  { %72 = vperm.xlu0 %1528, %v21_v13  }
  0x55   :  { %258 = vperm.xlu2 %1526, %v21_v13   ;;  %254 = vperm.xlu1 %1525, %v20_v5  }
  0x56   :  { %87 = vperm.xlu0 %1528, %v24_v14  }
  0x5c   :  { %v1622_v15 = vpop.permute.xlu2 %62 }
  0x5d   :  { %270 = vperm.xlu2 %1526, %v24_v14   ;;  %266 = vperm.xlu1 %1525, %v23_v7   ;;  %v1716_v60 = vmul.f32 %v1681_v44, %v1622_v15  ;;  %v1720_v61 = vmul.f32 %v1683_v45, %v1622_v15  ;;  %v1724_v62 = vmul.f32 %v1685_v46, %v1622_v15 }
  0x5e   :  { %342 = vperm.xlu0 %1528, %v28_v16   ;;  %v1728_v63 = vmul.f32 %v1687_v47, %v1622_v15  ;;  %v1732_v0 = vmul.f32 %v1690_v48, %v1622_v15  ;;  %v1736_v1 = vmul.f32 %v1692_v49, %v1622_v15  ;;  %v1740_v2 = vmul.f32 %v1694_v50, %v1622_v15  ;;  %v31_v16 = vld [vmem:[%s2807_s2 + $0x20] sm:$0xff] }
  0x5f   :  { %v1744_v3 = vmul.f32 %v1696_v51, %v1622_v15 }
  0x61   :  { %2833 = vst [vmem:[#allocation11_spill] sm:$0xff] %v1744_v3 }
  0x64   :  { %v1627_v17 = vpop.permute.xlu2 %67 }
  0x65   :  { %1529 = vset.pattern.permute.xlu2 %v1558_v4  ;;  %278 = vperm.xlu1 %1525, %v26_v9   ;;  %v1752_v5 = vmul.f32 %v1683_v45, %v1627_v17  ;;  %v1756_v6 = vmul.f32 %v1685_v46, %v1627_v17  ;;  %v1760_v7 = vmul.f32 %v1687_v47, %v1627_v17  ;;  %v32_v9 = vld [vmem:[%s2807_s2 + $0x28] sm:$0xff] }
  0x66   :  { %367 = vperm.xlu0 %1528, %v33_v18   ;;  %337 = vperm.xlu2 %1529, %v27_v19   ;;  %v1767_v10 = vmul.f32 %v1690_v48, %v1627_v17  ;;  %v1771_v11 = vmul.f32 %v1692_v49, %v1627_v17  ;;  %v1775_v12 = vmul.f32 %v1694_v50, %v1627_v17 }
  0x67   :  { %v1779_v13 = vmul.f32 %v1696_v51, %v1627_v17 }
  0x6c   :  { %v83_v32 = vpop.permute.xlu2 %82 }
  0x6d   :  { %1530 = vset.pattern.permute.xlu1 %v1558_v4  ;;  %v1748_v4 = vmul.f32 %v1681_v44, %v1627_v17  ;;  %v1785_v18 = vmul.f32 %v1681_v44, %v83_v32  ;;  %v1788_v19 = vmul.f32 %v1683_v45, %v83_v32  ;;  %v1791_v24 = vmul.f32 %v1685_v46, %v83_v32 }
  0x6e   :  { %382 = vperm.xlu0 %1528, %v36_v33   ;;  %352 = vperm.xlu2 %1529, %v30_v34   ;;  %v1794_v25 = vmul.f32 %v1687_v47, %v83_v32  ;;  %v1797_v17 = vmul.f32 %v1690_v48, %v83_v32  ;;  %v1800_v26 = vmul.f32 %v1692_v49, %v83_v32 }
  0x6f   :  { %347 = vperm.xlu1 %1530, %v29_v39   ;;  %v1803_v27 = vmul.f32 %v1694_v50, %v83_v32  ;;  %v1806_v28 = vmul.f32 %v1696_v51, %v83_v32 }
  0x74   :  { %v98_v8 = vpop.permute.xlu2 %97 }
  0x75   :  { %v53_v14 = vpop.permute.xlu1 %52  ;;  %v133_v15 = vpop.permute.xlu0 %132  ;;  %v1809_v29 = vmul.f32 %v1681_v44, %v98_v8  ;;  %v1812_v30 = vmul.f32 %v1683_v45, %v98_v8  ;;  %v1815_v31 = vmul.f32 %v1685_v46, %v98_v8  ;;  %v1818_v33 = vmul.f32 %v1687_v47, %v98_v8 }
  0x76   :  { %362 = vperm.xlu2 %1529, %v32_v9   ;;  %v1821_v34 = vmul.f32 %v1690_v48, %v98_v8  ;;  %v1824_v32 = vmul.f32 %v1692_v49, %v98_v8  ;;  %v1827_v35 = vmul.f32 %v1694_v50, %v98_v8  ;;  %v1830_v36 = vmul.f32 %v1696_v51, %v98_v8 }
  0x77   :  { %2834 = vst [vmem:[#allocation12_spill] sm:$0xff] %v1809_v29  ;;  %357 = vperm.xlu1 %1530, %v31_v16   ;;  %v111_v37 = vmul.f32 %v1681_v44, %v53_v14  ;;  %v112_v38 = vmul.f32 %v1683_v45, %v53_v14  ;;  %v576_v39 = vmul.f32 %v1685_v46, %v53_v14 }
  0x78   :  { %2835 = vst [vmem:[#allocation13_spill] sm:$0xff] %v1812_v30  ;;  %v577_v40 = vmul.f32 %v1687_v47, %v53_v14  ;;  %v886_v41 = vmul.f32 %v1690_v48, %v53_v14  ;;  %v887_v42 = vmul.f32 %v1692_v49, %v53_v14  ;;  %v1196_v43 = vmul.f32 %v1694_v50, %v53_v14 }
  0x79   :  { %2836 = vst [vmem:[#allocation14_spill] sm:$0xff] %v1815_v31  ;;  %v1197_v9 = vmul.f32 %v1696_v51, %v53_v14  ;;  %v1841_v16 = vmul.f32 %v1698_v52, %v133_v15  ;;  %v1844_v8 = vmul.f32 %v1700_v53, %v133_v15  ;;  %v1859_v14 = vmul.f32 %v1708_v57, %v133_v15 }
  0x7a   :  { %2837 = vst [vmem:[#allocation15_spill] sm:$0xff] %v1818_v33  ;;  %v1862_v33 = vmul.f32 %v1710_v58, %v133_v15  ;;  %v1865_v31 = vmul.f32 %v1712_v59, %v133_v15 }
  0x7b   :  { %2838 = vst [vmem:[#allocation16_spill] sm:$0xff] %v1821_v34  ;;  %v1856_v34 = vmul.f32 %v1706_v56, %v133_v15 }
  0x7c   :  { %2839 = vst [vmem:[#allocation17_spill] sm:$0xff] %v1824_v32  ;;  %v35_v32 = vld [vmem:[%s2807_s2 + $0x40] sm:$0xff] }
  0x7d   :  { %2840 = vst [vmem:[#allocation18_spill] sm:$0xff] %v1827_v35  ;;  %v1850_v35 = vmul.f32 %v1704_v55, %v133_v15  ;;  %v1867_v30 = vpop.permute.xlu1 %57  ;;  %v153_v29 = vpop.permute.xlu0 %152 }
  0x7e   :  { %2841 = vst [vmem:[#allocation19_spill] sm:$0xff] %v1830_v36  ;;  %v1847_v36 = vmul.f32 %v1702_v54, %v133_v15  ;;  %377 = vperm.xlu2 %1529, %v35_v32   ;;  %v195_v50 = vmul.f32 %v1698_v52, %v153_v29  ;;  %v196_v49 = vmul.f32 %v1700_v53, %v153_v29 }
  0x7f   :  { %2842 = vst [vmem:[#allocation20_spill] sm:$0xff] %v1841_v16  ;;  %v651_v16 = vperm.slane %v1644_v21, 6  ;;  %v612_v48 = vmul.f32 %v1702_v54, %v153_v29  ;;  %v923_v32 = vmul.f32 %v1708_v57, %v153_v29  ;;  %v1232_v15 = vmul.f32 %v1710_v58, %v153_v29 }
  0x80   :  { %2843 = vst [vmem:[#allocation21_spill] sm:$0xff] %v1844_v8  ;;  %v281_v8 = vperm.slane %v1639_v20, 2  ;;  %v1892_v51 = vadd.f32 %v196_v49, %v1752_v5 }
  0x81   :  { %2844 = vst [vmem:[#allocation22_spill] sm:$0xff] %v1847_v36  ;;  %v141_v36 = vpop.permute.xlu2 %140  ;;  %v1895_v23 = vadd.f32 %v612_v48, %v1756_v6  ;;  %v1904_v3 = vadd.f32 %v923_v32, %v1771_v11  ;;  %v38_v6 = vld [vmem:[%s2807_s2 + $0x58] sm:$0xff] }
  0x82   :  { %2845 = vst [vmem:[#allocation23_spill] sm:$0xff] %v1850_v35  ;;  %v34_v35 = vld [vmem:[%s2807_s2 + $0x38] sm:$0xff]  ;;  %v189_v49 = vmul.f32 %v1698_v52, %v141_v36  ;;  %v190_v48 = vmul.f32 %v1700_v53, %v141_v36  ;;  %v607_v5 = vmul.f32 %v1704_v55, %v141_v36  ;;  %v1226_v11 = vmul.f32 %v1710_v58, %v141_v36 }
  0x83   :  { %2846 = vst [vmem:[#allocation24_spill] sm:$0xff] %v1856_v34  ;;  %v282_v34 = vperm.slane %v1639_v20, 6  ;;  %v613_v20 = vmul.f32 %v1704_v55, %v153_v29  ;;  %372 = vperm.xlu1 %1530, %v34_v35  }
  0x84   :  { %2847 = vst [vmem:[#allocation25_spill] sm:$0xff] %v1859_v14  ;;  %v650_v14 = vperm.slane %v1644_v21, 2  ;;  %v922_v21 = vmul.f32 %v1706_v56, %v153_v29 }
  0x85   :  { %2848 = vst [vmem:[#allocation26_spill] sm:$0xff] %v1862_v33  ;;  %v1889_v33 = vadd.f32 %v195_v50, %v1748_v4  ;;  %v1898_v22 = vadd.f32 %v613_v20, %v1760_v7  ;;  %v606_v4 = vmul.f32 %v1702_v54, %v141_v36  ;;  %v916_v7 = vmul.f32 %v1706_v56, %v141_v36 }
  0x86   :  { %2849 = vst [vmem:[#allocation27_spill] sm:$0xff] %v1865_v31  ;;  %v1233_v31 = vmul.f32 %v1712_v59, %v153_v29  ;;  %v1901_v35 = vadd.f32 %v922_v21, %v1767_v10  ;;  %v1907_v29 = vadd.f32 %v1232_v15, %v1775_v12  ;;  %v917_v10 = vmul.f32 %v1708_v57, %v141_v36  ;;  %v37_v15 = vld [vmem:[%s2807_s2 + $0x50] sm:$0xff]  ;;  %s1560_s2 = smov [#allocation2]  }
  0x87   :  { %2850 = vst [vmem:[#allocation28_spill] sm:$0xff] %v1889_v33  ;;  %v1227_v12 = vmul.f32 %v1712_v59, %v141_v36  ;;  %v1928_v20 = vadd.f32 %v189_v49, %v111_v37  ;;  %v1930_v21 = vadd.f32 %v190_v48, %v112_v38  ;;  %v1932_v32 = vadd.f32 %v606_v4, %v576_v39  ;;  %s1497_s11 = sshll.u32 %s1560_s2, 4  ;;  %s1498_s11 = int_to_ptr.vmem [resolvable:$true] %s1497_s11 }
  0x88   :  { %2851 = vst [vmem:[#allocation29_spill] sm:$0xff] %v1892_v51  ;;  %v1910_v50 = vadd.f32 %v1233_v31, %v1779_v13  ;;  %v1923_v13 = vpop.permute.xlu1 %77  ;;  %v165_v31 = vpop.permute.xlu0 %164  ;;  %v1940_v36 = vadd.f32 %v1226_v11, %v1196_v43  ;;  %392 = vperm.xlu2 %1529, %v38_v6   ;;  %v1946_v37 = vperm.slane %v282_v34, 2  ;;  %v1948_v38 = vperm.slane %v650_v14, 2 }
  0x89   :  { %2852 = vst [vmem:[#allocation30_spill] sm:$0xff] %v1895_v23  ;;  %v1944_v23 = vperm.slane %v281_v8, 2  ;;  %v1950_v39 = vperm.slane %v651_v16, 2  ;;  %v1966_v34 = vmul.f32 %v1687_v47, %v1867_v30  ;;  %v201_v43 = vmul.f32 %v1698_v52, %v165_v31 }
  0x8a   :  { %2853 = vst [vmem:[#allocation31_spill] sm:$0xff] %v1898_v22  ;;  %v1942_v22 = vadd.f32 %v1227_v12, %v1197_v9  ;;  %v202_v9 = vmul.f32 %v1700_v53, %v165_v31  ;;  %v618_v16 = vmul.f32 %v1702_v54, %v165_v31  ;;  %v619_v8 = vmul.f32 %v1704_v55, %v165_v31 }
  0x8b   :  { %2854 = vst [vmem:[#allocation32_spill] sm:$0xff] %v1901_v35  ;;  %v1938_v35 = vadd.f32 %v917_v10, %v887_v42  ;;  %387 = vperm.xlu1 %1530, %v37_v15   ;;  %v1962_v42 = vmul.f32 %v1685_v46, %v1867_v30  ;;  %v928_v14 = vmul.f32 %v1706_v56, %v165_v31 }
  0x8c   :  { %2855 = vst [vmem:[#allocation33_spill] sm:$0xff] %v1904_v3  ;;  %v1936_v3 = vadd.f32 %v916_v7, %v886_v41  ;;  %v1958_v41 = vmul.f32 %v1683_v45, %v1867_v30  ;;  %v929_v49 = vmul.f32 %v1708_v57, %v165_v31  ;;  %v1238_v48 = vmul.f32 %v1710_v58, %v165_v31 }
  0x8d   :  { %2856 = vst [vmem:[#allocation34_spill] sm:$0xff] %v1907_v29  ;;  %v149_v29 = vpop.permute.xlu2 %148  ;;  %v1239_v4 = vmul.f32 %v1712_v59, %v165_v31  ;;  %v1980_v6 = vadd.f32 %v202_v9, %v1788_v19  ;;  %v1983_v7 = vadd.f32 %v618_v16, %v1791_v24  ;;  %v1986_v10 = vadd.f32 %v619_v8, %v1794_v25 }
  0x8e   :  { %2857 = vst [vmem:[#allocation35_spill] sm:$0xff] %v1910_v50  ;;  %v1934_v50 = vadd.f32 %v607_v5, %v577_v40  ;;  %v1954_v40 = vmul.f32 %v1681_v44, %v1867_v30  ;;  %v1977_v5 = vadd.f32 %v201_v43, %v1785_v18  ;;  %v1989_v11 = vadd.f32 %v928_v14, %v1797_v17 }
  0x8f   :  { %2858 = vst [vmem:[#allocation36_spill] sm:$0xff] %v1928_v20  ;;  %v1992_v12 = vadd.f32 %v929_v49, %v1800_v26  ;;  %v1995_v31 = vadd.f32 %v1238_v48, %v1803_v27  ;;  %v1998_v18 = vadd.f32 %v1239_v4, %v1806_v28  ;;  %v193_v24 = vmul.f32 %v1698_v52, %v149_v29 }
  0x90   :  { %2859 = vst [vmem:[#allocation37_spill] sm:$0xff] %v1930_v21  ;;  %v2000_v19 = vpop.permute.xlu1 %92  ;;  %v177_v15 = vpop.permute.xlu0 %176  ;;  %v194_v25 = vmul.f32 %v1700_v53, %v149_v29  ;;  %v610_v43 = vmul.f32 %v1702_v54, %v149_v29  ;;  %v611_v17 = vmul.f32 %v1704_v55, %v149_v29  ;;  %v920_v26 = vmul.f32 %v1706_v56, %v149_v29 }
  0x91   :  { %2860 = vst [vmem:[#allocation38_spill] sm:$0xff] %v1932_v32  ;;  %v921_v27 = vmul.f32 %v1708_v57, %v149_v29  ;;  %v1230_v16 = vmul.f32 %v1710_v58, %v149_v29  ;;  %v1231_v28 = vmul.f32 %v1712_v59, %v149_v29  ;;  %v2011_v8 = vadd.f32 %v193_v24, %v1716_v60  ;;  %v2881_v60 = vld [vmem:[#allocation11_spill] sm:$0xff] }
  0x92   :  { %2861 = vst [vmem:[#allocation39_spill] sm:$0xff] %v1934_v50  ;;  %v2014_v14 = vadd.f32 %v194_v25, %v1720_v61  ;;  %v2017_v49 = vadd.f32 %v610_v43, %v1724_v62  ;;  %v2020_v48 = vadd.f32 %v611_v17, %v1728_v63  ;;  %v2023_v4 = vadd.f32 %v920_v26, %v1732_v0  ;;  %v2885_v17 = vld [vmem:[#allocation9_spill] sm:$0xff] }
  0x93   :  { %2862 = vst [vmem:[#allocation40_spill] sm:$0xff] %v1936_v3  ;;  %v2029_v29 = vadd.f32 %v1230_v16, %v1740_v2  ;;  %v2032_v24 = vadd.f32 %v1231_v28, %v2881_v60  ;;  %v121_v61 = vmul.f32 %v1681_v44, %v1923_v13  ;;  %v122_v62 = vmul.f32 %v1683_v45, %v1923_v13  ;;  %v2884_v2 = vld [vmem:[#allocation8_spill] sm:$0xff] }
  0x94   :  { %2863 = vst [vmem:[#allocation41_spill] sm:$0xff] %v1938_v35  ;;  %v586_v63 = vmul.f32 %v1685_v46, %v1923_v13  ;;  %v587_v0 = vmul.f32 %v1687_v47, %v1923_v13  ;;  %v897_v43 = vmul.f32 %v2884_v2, %v1923_v13  ;;  %v1206_v26 = vmul.f32 %v2885_v17, %v1923_v13 }
  0x95   :  { %2864 = vst [vmem:[#allocation42_spill] sm:$0xff] %v1940_v36  ;;  %v161_v9 = vpop.permute.xlu2 %160  ;;  %v2051_v28 = vmul.f32 %v1698_v52, %v177_v15  ;;  %v2054_v60 = vmul.f32 %v1700_v53, %v177_v15 }
  0x96   :  { %2865 = vst [vmem:[#allocation43_spill] sm:$0xff] %v1942_v22  ;;  %v2026_v22 = vadd.f32 %v921_v27, %v1736_v1  ;;  %v2883_v1 = vld [vmem:[#allocation7_spill] sm:$0xff]  ;;  %v2886_v27 = vld [vmem:[#allocation10_spill] sm:$0xff]  ;;  %v617_v36 = vmul.f32 %v1704_v55, %v161_v9  ;;  %v926_v50 = vmul.f32 %v1706_v56, %v161_v9  ;;  %v927_v32 = vmul.f32 %v1708_v57, %v161_v9 }
  0x97   :  { %2866 = vst [vmem:[#allocation44_spill] sm:$0xff] %v1977_v5  ;;  %v896_v25 = vmul.f32 %v2883_v1, %v1923_v13  ;;  %v1207_v16 = vmul.f32 %v2886_v27, %v1923_v13  ;;  %v2069_v13 = vmul.f32 %v1710_v58, %v177_v15  ;;  %v1236_v21 = vmul.f32 %v1710_v58, %v161_v9 }
  0x98   :  { %2867 = vst [vmem:[#allocation45_spill] sm:$0xff] %v1980_v6  ;;  %v137_v3 = vpop.permute.xlu1 %136  ;;  %v1237_v20 = vmul.f32 %v1712_v59, %v161_v9 }
  0x99   :  { %2868 = vst [vmem:[#allocation46_spill] sm:$0xff] %v1983_v7 }
  0x9a   :  { %2869 = vst [vmem:[#allocation47_spill] sm:$0xff] %v1986_v10 }
  0x9b   :  { %2870 = vst [vmem:[#allocation48_spill] sm:$0xff] %v1989_v11 }
  0x9c   :  { %2871 = vst [vmem:[#allocation49_spill] sm:$0xff] %v1992_v12 }
  0x9d   :  { %2872 = vst [vmem:[#allocation50_spill] sm:$0xff] %v1995_v31  ;;  %v173_v35 = vpop.permute.xlu2 %172 }
  0x9e   :  { %2873 = vst [vmem:[#allocation51_spill] sm:$0xff] %v1998_v18  ;;  %v2099_v18 = vmul.f32 %v1698_v52, %v173_v35 }
  0x9f   :  { %2874 = vst [vmem:[#allocation52_spill] sm:$0xff] %v2011_v8  ;;  %v616_v8 = vmul.f32 %v1702_v54, %v161_v9 }
  0xa0   :  { %2875 = vst [vmem:[#allocation53_spill] sm:$0xff] %v2014_v14  ;;  %v200_v14 = vmul.f32 %v1700_v53, %v161_v9 }
  0xa1   :  { %2876 = vst [vmem:[#allocation54_spill] sm:$0xff] %v2017_v49  ;;  %v199_v49 = vmul.f32 %v1698_v52, %v161_v9  ;;  %v2102_v9 = vmul.f32 %v1700_v53, %v173_v35 }
  0xa2   :  { %2877 = vst [vmem:[#allocation55_spill] sm:$0xff] %v2020_v48  ;;  %v2072_v48 = vmul.f32 %v1712_v59, %v177_v15 }
  0xa3   :  { %2878 = vst [vmem:[#allocation56_spill] sm:$0xff] %v2023_v4  ;;  %v2066_v4 = vmul.f32 %v1708_v57, %v177_v15 }
  0xa4   :  { %2879 = vst [vmem:[#allocation57_spill] sm:$0xff] %v2026_v22  ;;  %v2063_v22 = vmul.f32 %v1706_v56, %v177_v15 }
  0xa5   :  { %2880 = vst [vmem:[#allocation58_spill] sm:$0xff] %v2029_v29  ;;  %v2060_v29 = vmul.f32 %v1704_v55, %v177_v15 }
  0xa6   :  { %2882 = vst [vmem:[#allocation11_spill] sm:$0xff] %v2032_v24  ;;  %v2057_v24 = vmul.f32 %v1702_v54, %v177_v15  ;;  %v243_v15 = vpop.permute.xlu0 %242 }
  0xa7   :  { %2887 = vst [vmem:[#allocation7_spill] sm:$0xff] %v2051_v28  ;;  %v2096_v28 = vadd.f32 %v1237_v20, %v1207_v16  ;;  %v2117_v20 = vmul.f32 %v1710_v58, %v173_v35  ;;  %v2160_v16 = vmul.f32 %v2886_v27, %v2000_v19  ;;  %v2220_v31 = vmul.f32 %v1950_v39, %v243_v15 }
  0xa8   :  { %2888 = vst [vmem:[#allocation8_spill] sm:$0xff] %v2054_v60  ;;  %v2094_v60 = vadd.f32 %v1236_v21, %v1206_v26  ;;  %v2114_v21 = vmul.f32 %v1708_v57, %v173_v35  ;;  %v2156_v26 = vmul.f32 %v2885_v17, %v2000_v19 }
  0xa9   :  { %2889 = vst [vmem:[#allocation9_spill] sm:$0xff] %v2057_v24  ;;  %v2092_v24 = vadd.f32 %v927_v32, %v897_v43  ;;  %v2120_v32 = vmul.f32 %v1712_v59, %v173_v35  ;;  %v2148_v43 = vmul.f32 %v2883_v1, %v2000_v19 }
  0xaa   :  { %2890 = vst [vmem:[#allocation10_spill] sm:$0xff] %v2060_v29  ;;  %v2090_v29 = vadd.f32 %v926_v50, %v896_v25  ;;  %v2111_v50 = vmul.f32 %v1706_v56, %v173_v35  ;;  %v2144_v25 = vmul.f32 %v1687_v47, %v2000_v19 }
  0xab   :  { %2891 = vst [vmem:[#allocation59_spill] sm:$0xff] %v2063_v22  ;;  %v2088_v22 = vadd.f32 %v617_v36, %v587_v0  ;;  %v2108_v36 = vmul.f32 %v1704_v55, %v173_v35  ;;  %v2140_v0 = vmul.f32 %v1685_v46, %v2000_v19 }
  0xac   :  { %2892 = vst [vmem:[#allocation60_spill] sm:$0xff] %v2066_v4  ;;  %v2086_v4 = vadd.f32 %v616_v8, %v586_v63  ;;  %v888_v8 = vmul.f32 %v2883_v1, %v1867_v30  ;;  %v2132_v63 = vmul.f32 %v1681_v44, %v2000_v19 }
  0xad   :  { %2893 = vst [vmem:[#allocation61_spill] sm:$0xff] %v2069_v13  ;;  %v2084_v13 = vadd.f32 %v200_v14, %v122_v62  ;;  %v2105_v14 = vmul.f32 %v1702_v54, %v173_v35  ;;  %v1199_v62 = vmul.f32 %v2886_v27, %v1867_v30  ;;  %v2136_v35 = vmul.f32 %v1683_v45, %v2000_v19 }
  0xae   :  { %2894 = vst [vmem:[#allocation62_spill] sm:$0xff] %v2072_v48  ;;  %v2082_v48 = vadd.f32 %v199_v49, %v121_v61  ;;  %v889_v49 = vmul.f32 %v2884_v2, %v1867_v30  ;;  %v1198_v61 = vmul.f32 %v2885_v17, %v1867_v30  ;;  %v2152_v30 = vmul.f32 %v2884_v2, %v2000_v19 }
  0xaf   :  { %2896 = vst [vmem:[#allocation64_spill] sm:$0xff] %v2084_v13  ;;  %v2178_v19 = vmul.f32 %v1708_v57, %v137_v3 }
  0xb0   :  { %2895 = vst [vmem:[#allocation63_spill] sm:$0xff] %v2082_v48  ;;  %v2217_v48 = vmul.f32 %v1948_v38, %v243_v15 }
  0xb1   :  { %2897 = vst [vmem:[#allocation65_spill] sm:$0xff] %v2086_v4 }
  0xb2   :  { %2898 = vst [vmem:[#allocation66_spill] sm:$0xff] %v2088_v22 }
  0xb3   :  { %2899 = vst [vmem:[#allocation67_spill] sm:$0xff] %v2090_v29 }
  0xb4   :  { %2900 = vst [vmem:[#allocation68_spill] sm:$0xff] %v2092_v24 }
  0xb5   :  { %2901 = vst [vmem:[#allocation69_spill] sm:$0xff] %v2094_v60 }
  0xb6   :  { %2902 = vst [vmem:[#allocation70_spill] sm:$0xff] %v2096_v28 }
  0xb7   :  { %2903 = vst [vmem:[#allocation71_spill] sm:$0xff] %v2099_v18 }
  0xb8   :  { %2904 = vst [vmem:[#allocation72_spill] sm:$0xff] %v2102_v9 }
  0xb9   :  { %2905 = vst [vmem:[#allocation73_spill] sm:$0xff] %v2105_v14  ;;  %v2919_v14 = vld [vmem:[#allocation5_spill] sm:$0xff] }
  0xba   :  { %2906 = vst [vmem:[#allocation74_spill] sm:$0xff] %v2108_v36  ;;  %v239_v36 = vpop.permute.xlu2 %238 }
  0xbb   :  { %2907 = vst [vmem:[#allocation75_spill] sm:$0xff] %v2111_v50  ;;  %v2169_v50 = vmul.f32 %v1702_v54, %v137_v3 }
  0xbc   :  { %2908 = vst [vmem:[#allocation76_spill] sm:$0xff] %v2114_v21  ;;  %v2166_v21 = vmul.f32 %v1700_v53, %v137_v3 }
  0xbd   :  { %2909 = vst [vmem:[#allocation77_spill] sm:$0xff] %v2117_v20  ;;  %v2163_v20 = vmul.f32 %v1698_v52, %v137_v3 }
  0xbe   :  { %2910 = vst [vmem:[#allocation78_spill] sm:$0xff] %v2120_v32  ;;  %v145_v32 = vpop.permute.xlu1 %144 }
  0xbf   :  { %2911 = vst [vmem:[#allocation79_spill] sm:$0xff] %v2132_v63  ;;  %v2922_v63 = vld [vmem:[#allocation6_spill] sm:$0xff]  ;;  %v191_v22 = vmul.f32 %v1698_v52, %v145_v32  ;;  %v608_v4 = vmul.f32 %v1702_v54, %v145_v32  ;;  %v1228_v13 = vmul.f32 %v1710_v58, %v145_v32 }
  0xc0   :  { %2912 = vst [vmem:[#allocation80_spill] sm:$0xff] %v2136_v35  ;;  %v2921_v35 = vperm.slane %v2919_v14, 6  ;;  %v2923_v28 = vperm.slane %v2922_v63, 2  ;;  %v2925_v24 = vperm.slane %v2922_v63, 6  ;;  %v2211_v63 = vmul.f32 %v1944_v23, %v243_v15 }
  0xc1   :  { %2913 = vst [vmem:[#allocation81_spill] sm:$0xff] %v2140_v0  ;;  %v2920_v0 = vperm.slane %v2919_v14, 2  ;;  %v918_v14 = vmul.f32 %v1706_v56, %v145_v32 }
  0xc2   :  { %2914 = vst [vmem:[#allocation82_spill] sm:$0xff] %v2144_v25  ;;  %v2184_v25 = vmul.f32 %v1712_v59, %v137_v3  ;;  %v2192_v18 = vperm.slane %v2921_v35, 2  ;;  %v2196_v60 = vperm.slane %v2923_v28, 2  ;;  %v2200_v29 = vperm.slane %v2925_v24, 2 }
  0xc3   :  { %2915 = vst [vmem:[#allocation83_spill] sm:$0xff] %v2148_v43  ;;  %v263_v43 = vpop.permute.xlu0 %262  ;;  %v2188_v9 = vperm.slane %v2920_v0, 2  ;;  %v609_v0 = vmul.f32 %v1704_v55, %v145_v32  ;;  %v919_v35 = vmul.f32 %v1708_v57, %v145_v32  ;;  %v1229_v28 = vmul.f32 %v1712_v59, %v145_v32 }
  0xc4   :  { %2916 = vst [vmem:[#allocation84_spill] sm:$0xff] %v2152_v30  ;;  %v2172_v30 = vmul.f32 %v1704_v55, %v137_v3  ;;  %v2214_v24 = vmul.f32 %v1946_v37, %v243_v15  ;;  %v2226_v11 = vmul.f32 %v2192_v18, %v243_v15 }
  0xc5   :  { %2917 = vst [vmem:[#allocation85_spill] sm:$0xff] %v2156_v26  ;;  %v2175_v26 = vmul.f32 %v1706_v56, %v137_v3  ;;  %v2223_v12 = vmul.f32 %v2188_v9, %v243_v15  ;;  %v2248_v7 = vadd.f32 %v919_v35, %v889_v49  ;;  %v2275_v49 = vmul.f32 %v2196_v60, %v263_v43 }
  0xc6   :  { %2918 = vst [vmem:[#allocation86_spill] sm:$0xff] %v2160_v16  ;;  %v2181_v16 = vmul.f32 %v1710_v58, %v137_v3  ;;  %v192_v3 = vmul.f32 %v1700_v53, %v145_v32  ;;  %v2229_v32 = vmul.f32 %v2196_v60, %v243_v15  ;;  %v157_v10 = vpop.permute.xlu1 %156  ;;  %v2293_v35 = vmul.f32 %v2188_v9, %v239_v36 }
  0xc7   :  { %2924 = vst [vmem:[#allocation5_spill] sm:$0xff] %v2196_v60 }
  0xc8   :  { %2926 = vst [vmem:[#allocation6_spill] sm:$0xff] %v2200_v29 }
  0xc9   :  { %2927 = vst [vmem:[#allocation87_spill] sm:$0xff] %v2211_v63  ;;  %v2232_v63 = vmul.f32 %v2200_v29, %v243_v15  ;;  %v2252_v15 = vadd.f32 %v1229_v28, %v1199_v62  ;;  %v2281_v62 = vmul.f32 %v1944_v23, %v239_v36  ;;  %v2296_v28 = vmul.f32 %v2192_v18, %v239_v36 }
  0xca   :  { %2928 = vst [vmem:[#allocation88_spill] sm:$0xff] %v2214_v24  ;;  %v2235_v24 = vadd.f32 %v191_v22, %v1954_v40  ;;  %v251_v40 = vpop.permute.xlu2 %250 }
  0xcb   :  { %2929 = vst [vmem:[#allocation89_spill] sm:$0xff] %v2217_v48  ;;  %v2238_v48 = vadd.f32 %v192_v3, %v1958_v41  ;;  %v2254_v22 = vpop.permute.xlu0 %274  ;;  %v2257_v41 = vmul.f32 %v1944_v23, %v263_v43  ;;  %v2284_v3 = vmul.f32 %v1946_v37, %v239_v36  ;;  %v2335_v6 = vmul.f32 %v1948_v38, %v251_v40 }
  0xcc   :  { %2930 = vst [vmem:[#allocation90_spill] sm:$0xff] %v2220_v31  ;;  %v2241_v31 = vadd.f32 %v608_v4, %v1962_v42  ;;  %v2260_v42 = vmul.f32 %v1946_v37, %v263_v43  ;;  %v2266_v4 = vmul.f32 %v1950_v39, %v263_v43  ;;  %v2338_v5 = vmul.f32 %v1950_v39, %v251_v40 }
  0xcd   :  { %2931 = vst [vmem:[#allocation91_spill] sm:$0xff] %v2223_v12  ;;  %v2244_v12 = vadd.f32 %v609_v0, %v1966_v34  ;;  %v2263_v34 = vmul.f32 %v1948_v38, %v263_v43  ;;  %v2287_v0 = vmul.f32 %v1948_v38, %v239_v36 }
  0xce   :  { %2932 = vst [vmem:[#allocation92_spill] sm:$0xff] %v2226_v11  ;;  %v2246_v11 = vadd.f32 %v918_v14, %v888_v8  ;;  %v2272_v8 = vmul.f32 %v2192_v18, %v263_v43  ;;  %v2290_v14 = vmul.f32 %v1950_v39, %v239_v36  ;;  %v169_v51 = vpop.permute.xlu1 %168 }
  0xcf   :  { %2933 = vst [vmem:[#allocation93_spill] sm:$0xff] %v2229_v32  ;;  %v2250_v32 = vadd.f32 %v1228_v13, %v1198_v61  ;;  %v2269_v13 = vmul.f32 %v2188_v9, %v263_v43  ;;  %v2278_v61 = vmul.f32 %v2200_v29, %v263_v43  ;;  %v2299_v43 = vmul.f32 %v2196_v60, %v239_v36 }
  0xd0   :  { %2934 = vst [vmem:[#allocation94_spill] sm:$0xff] %v2232_v63  ;;  %v2332_v63 = vmul.f32 %v1946_v37, %v251_v40  ;;  %v2341_v33 = vmul.f32 %v1698_v52, %v169_v51 }
  0xd1   :  { %2935 = vst [vmem:[#allocation95_spill] sm:$0xff] %v2238_v48 }
  0xd2   :  { %2936 = vst [vmem:[#allocation96_spill] sm:$0xff] %v2241_v31 }
  0xd3   :  { %2937 = vst [vmem:[#allocation97_spill] sm:$0xff] %v2244_v12 }
  0xd4   :  { %2938 = vst [vmem:[#allocation98_spill] sm:$0xff] %v2246_v11 }
  0xd5   :  { %2939 = vst [vmem:[#allocation99_spill] sm:$0xff] %v2248_v7 }
  0xd6   :  { %2940 = vst [vmem:[#allocation100_spill] sm:$0xff] %v2250_v32  ;;  %v2990_v32 = vld [vmem:[#allocation27_spill] sm:$0xff] }
  0xd7   :  { %2941 = vst [vmem:[#allocation101_spill] sm:$0xff] %v2252_v15  ;;  %v2989_v15 = vld [vmem:[#allocation26_spill] sm:$0xff] }
  0xd8   :  { %2942 = vst [vmem:[#allocation102_spill] sm:$0xff] %v2254_v22  ;;  %v2302_v22 = vmul.f32 %v2200_v29, %v239_v36  ;;  %v2323_v36 = vmul.f32 %v1710_v58, %v157_v10 }
  0xd9   :  { %2943 = vst [vmem:[#allocation103_spill] sm:$0xff] %v2257_v41  ;;  %v2329_v41 = vmul.f32 %v1944_v23, %v251_v40 }
  0xda   :  { %2944 = vst [vmem:[#allocation104_spill] sm:$0xff] %v2260_v42  ;;  %v2326_v42 = vmul.f32 %v1712_v59, %v157_v10 }
  0xdb   :  { %2945 = vst [vmem:[#allocation105_spill] sm:$0xff] %v2263_v34  ;;  %v2320_v34 = vmul.f32 %v1708_v57, %v157_v10 }
  0xdc   :  { %2946 = vst [vmem:[#allocation106_spill] sm:$0xff] %v2266_v4  ;;  %v2317_v4 = vmul.f32 %v1706_v56, %v157_v10 }
  0xdd   :  { %2947 = vst [vmem:[#allocation107_spill] sm:$0xff] %v2269_v13  ;;  %v2314_v13 = vmul.f32 %v1704_v55, %v157_v10 }
  0xde   :  { %2948 = vst [vmem:[#allocation108_spill] sm:$0xff] %v2272_v8  ;;  %v2311_v8 = vmul.f32 %v1702_v54, %v157_v10 }
  0xdf   :  { %2949 = vst [vmem:[#allocation109_spill] sm:$0xff] %v2275_v49  ;;  %v2308_v49 = vmul.f32 %v1700_v53, %v157_v10 }
  0xe0   :  { %2950 = vst [vmem:[#allocation110_spill] sm:$0xff] %v2278_v61  ;;  %v2305_v61 = vmul.f32 %v1698_v52, %v157_v10  ;;  %v2347_v10 = vmul.f32 %v1702_v54, %v169_v51  ;;  %v2362_v52 = vmul.f32 %v1712_v59, %v169_v51  ;;  %v2365_v54 = vmul.f32 %v2188_v9, %v251_v40 }
  0xe1   :  { %2951 = vst [vmem:[#allocation111_spill] sm:$0xff] %v2281_v62 }
  0xe2   :  { %2952 = vst [vmem:[#allocation112_spill] sm:$0xff] %v2284_v3 }
  0xe3   :  { %2953 = vst [vmem:[#allocation113_spill] sm:$0xff] %v2287_v0  ;;  %v2987_v0 = vld [vmem:[#allocation24_spill] sm:$0xff] }
  0xe4   :  { %2954 = vst [vmem:[#allocation114_spill] sm:$0xff] %v2290_v14  ;;  %v2986_v14 = vld [vmem:[#allocation23_spill] sm:$0xff] }
  0xe5   :  { %2955 = vst [vmem:[#allocation115_spill] sm:$0xff] %v2293_v35 }
  0xe6   :  { %2956 = vst [vmem:[#allocation116_spill] sm:$0xff] %v2296_v28  ;;  %v2985_v28 = vld [vmem:[#allocation22_spill] sm:$0xff] }
  0xe7   :  { %2957 = vst [vmem:[#allocation117_spill] sm:$0xff] %v2299_v43  ;;  %v2353_v43 = vmul.f32 %v1706_v56, %v169_v51  ;;  %v2374_v56 = vmul.f32 %v2200_v29, %v251_v40 }
  0xe8   :  { %2958 = vst [vmem:[#allocation118_spill] sm:$0xff] %v2302_v22  ;;  %v2344_v22 = vmul.f32 %v1700_v53, %v169_v51  ;;  %v43_v53 = vpop.permute.xlu0 %42 }
  0xe9   :  { %2959 = vst [vmem:[#allocation119_spill] sm:$0xff] %v2329_v41  ;;  %v2350_v41 = vmul.f32 %v1704_v55, %v169_v51  ;;  %v2368_v55 = vmul.f32 %v2192_v18, %v251_v40 }
  0xea   :  { %2960 = vst [vmem:[#allocation120_spill] sm:$0xff] %v2332_v63  ;;  %v259_v63 = vpop.permute.xlu2 %258 }
  0xeb   :  { %2961 = vst [vmem:[#allocation121_spill] sm:$0xff] %v2335_v6  ;;  %v2356_v6 = vmul.f32 %v1708_v57, %v169_v51  ;;  %v2377_v57 = vmul.f32 %v1944_v23, %v259_v63  ;;  %v2386_v59 = vmul.f32 %v1950_v39, %v259_v63 }
  0xec   :  { %2962 = vst [vmem:[#allocation122_spill] sm:$0xff] %v2338_v5  ;;  %v2359_v5 = vmul.f32 %v1710_v58, %v169_v51  ;;  %v2380_v58 = vmul.f32 %v1946_v37, %v259_v63  ;;  %v2383_v51 = vmul.f32 %v1948_v38, %v259_v63 }
  0xed   :  { %2963 = vst [vmem:[#allocation123_spill] sm:$0xff] %v2341_v33  ;;  %v2406_v33 = vmul.f32 %v2200_v29, %v259_v63 }
  0xee   :  { %2964 = vst [vmem:[#allocation124_spill] sm:$0xff] %v2344_v22  ;;  %v2403_v22 = vmul.f32 %v2196_v60, %v259_v63 }
  0xef   :  { %2965 = vst [vmem:[#allocation125_spill] sm:$0xff] %v2347_v10  ;;  %v2400_v10 = vmul.f32 %v2192_v18, %v259_v63 }
  0xf0   :  { %2966 = vst [vmem:[#allocation126_spill] sm:$0xff] %v2350_v41  ;;  %v2371_v41 = vmul.f32 %v2196_v60, %v251_v40  ;;  %v573_v40 = vmul.f32 %v1687_v47, %v43_v53 }
  0xf1   :  { %2967 = vst [vmem:[#allocation127_spill] sm:$0xff] %v2353_v43  ;;  %v2397_v43 = vmul.f32 %v2188_v9, %v259_v63 }
  0xf2   :  { %2968 = vst [vmem:[#allocation128_spill] sm:$0xff] %v2356_v6  ;;  %v1193_v6 = vmul.f32 %v2886_v27, %v43_v53 }
  0xf3   :  { %2969 = vst [vmem:[#allocation129_spill] sm:$0xff] %v2359_v5  ;;  %v1192_v5 = vmul.f32 %v2885_v17, %v43_v53 }
  0xf4   :  { %2970 = vst [vmem:[#allocation130_spill] sm:$0xff] %v2362_v52  ;;  %v883_v52 = vmul.f32 %v2884_v2, %v43_v53  ;;  %v1247_v7 = vadd.f32 %v2990_v32, %v1193_v6 }
  0xf5   :  { %2971 = vst [vmem:[#allocation131_spill] sm:$0xff] %v2365_v54  ;;  %v108_v54 = vmul.f32 %v1683_v45, %v43_v53 }
  0xf6   :  { %2972 = vst [vmem:[#allocation132_spill] sm:$0xff] %v2368_v55  ;;  %v107_v55 = vmul.f32 %v1681_v44, %v43_v53 }
  0xf7   :  { %2973 = vst [vmem:[#allocation133_spill] sm:$0xff] %v2371_v41  ;;  %v572_v41 = vmul.f32 %v1685_v46, %v43_v53 }
  0xf8   :  { %2974 = vst [vmem:[#allocation134_spill] sm:$0xff] %v2374_v56  ;;  %v882_v56 = vmul.f32 %v2883_v1, %v43_v53  ;;  %v627_v53 = vadd.f32 %v2986_v14, %v573_v40 }
  0xf9   :  { %2975 = vst [vmem:[#allocation135_spill] sm:$0xff] %v2377_v57  ;;  %v626_v35 = vadd.f32 %v2985_v28, %v572_v41  ;;  %v48_v41 = vpop.permute.xlu0 %47  ;;  %v2420_v28 = vpop.permute.xlu2 %270 }
  0xfa   :  { %2976 = vst [vmem:[#allocation136_spill] sm:$0xff] %v2380_v58  ;;  %v2984_v58 = vld [vmem:[#allocation21_spill] sm:$0xff]  ;;  %v936_v3 = vadd.f32 %v2987_v0, %v882_v56  ;;  %v109_v32 = vmul.f32 %v1681_v44, %v48_v41  ;;  %v884_v56 = vmul.f32 %v2883_v1, %v48_v41  ;;  %v1195_v40 = vmul.f32 %v2886_v27, %v48_v41 }
  0xfb   :  { %2977 = vst [vmem:[#allocation137_spill] sm:$0xff] %v2383_v51  ;;  %v210_v57 = vadd.f32 %v2984_v58, %v108_v54  ;;  %v885_v58 = vmul.f32 %v2884_v2, %v48_v41 }
  0xfc   :  { %2978 = vst [vmem:[#allocation138_spill] sm:$0xff] %v2386_v59  ;;  %v2983_v59 = vld [vmem:[#allocation20_spill] sm:$0xff]  ;;  %v2447_v31 = vadd.f32 %v2175_v26, %v884_v56 }
  0xfd   :  { %2979 = vst [vmem:[#allocation139_spill] sm:$0xff] %v2397_v43  ;;  %v209_v51 = vadd.f32 %v2983_v59, %v107_v55  ;;  %v2988_v43 = vld [vmem:[#allocation25_spill] sm:$0xff]  ;;  %v1194_v59 = vmul.f32 %v2885_v17, %v48_v41  ;;  %v2450_v48 = vadd.f32 %v2178_v19, %v885_v58 }
  0xfe   :  { %2980 = vst [vmem:[#allocation140_spill] sm:$0xff] %v2400_v10  ;;  %v937_v62 = vadd.f32 %v2988_v43, %v883_v52  ;;  %v1246_v10 = vadd.f32 %v2989_v15, %v1192_v5  ;;  %v110_v15 = vmul.f32 %v1683_v45, %v48_v41  ;;  %v574_v43 = vmul.f32 %v1685_v46, %v48_v41 }
  0xff   :  { %2981 = vst [vmem:[#allocation141_spill] sm:$0xff] %v2403_v22  ;;  %v235_v22 = vpop.permute.xlu1 %234  ;;  %v575_v52 = vmul.f32 %v1687_v47, %v48_v41  ;;  %v2453_v41 = vadd.f32 %v2181_v16, %v1194_v59 }
 0x100   :  { %2982 = vst [vmem:[#allocation142_spill] sm:$0xff] %v2406_v33  ;;  %v287_v63 = vmul.f32 %v1944_v23, %v235_v22  ;;  %v288_v33 = vmul.f32 %v1946_v37, %v235_v22  ;;  %v656_v55 = vmul.f32 %v1948_v38, %v235_v22  ;;  %v657_v54 = vmul.f32 %v1950_v39, %v235_v22 }
 0x101   :  { %2991 = vst [vmem:[#allocation20_spill] sm:$0xff] %v2420_v28  ;;  %v966_v0 = vmul.f32 %v2188_v9, %v235_v22  ;;  %v967_v14 = vmul.f32 %v2192_v18, %v235_v22  ;;  %v1276_v5 = vmul.f32 %v2196_v60, %v235_v22  ;;  %v1277_v6 = vmul.f32 %v2200_v29, %v235_v22 }
 0x102   :  { %v2435_v28 = vadd.f32 %v2163_v20, %v109_v32  ;;  %v2438_v22 = vadd.f32 %v2166_v21, %v110_v15  ;;  %v2441_v11 = vadd.f32 %v2169_v50, %v574_v43  ;;  %v2444_v12 = vadd.f32 %v2172_v30, %v575_v52  ;;  %2994 = vst [vmem:[#allocation23_spill] sm:$0xff] %v2450_v48 }
 0x103   :  { %2995 = vst [vmem:[#allocation24_spill] sm:$0xff] %v2453_v41  ;;  %v2456_v20 = vadd.f32 %v2184_v25, %v1195_v40  ;;  %v311_v21 = vadd.f32 %v287_v63, %v209_v51  ;;  %v312_v32 = vadd.f32 %v288_v33, %v210_v57  ;;  %v680_v15 = vadd.f32 %v656_v55, %v626_v35  ;;  %v73_v33 = vpop.permute.xlu0 %72 }
 0x104   :  { %2992 = vst [vmem:[#allocation21_spill] sm:$0xff] %v2441_v11  ;;  %v681_v50 = vadd.f32 %v657_v54, %v627_v53  ;;  %v990_v11 = vadd.f32 %v966_v0, %v936_v3  ;;  %v991_v30 = vadd.f32 %v967_v14, %v937_v62  ;;  %v1300_v52 = vadd.f32 %v1276_v5, %v1246_v10  ;;  %v338_v14 = vpop.permute.xlu2 %337 }
 0x105   :  { %2993 = vst [vmem:[#allocation22_spill] sm:$0xff] %v2444_v12  ;;  %v1301_v12 = vadd.f32 %v1277_v6, %v1247_v7  ;;  %v119_v10 = vmul.f32 %v1681_v44, %v73_v33  ;;  %v120_v57 = vmul.f32 %v1683_v45, %v73_v33  ;;  %v584_v51 = vmul.f32 %v1685_v46, %v73_v33 }
 0x106   :  { %2996 = vst [vmem:[#allocation25_spill] sm:$0xff] %v2456_v20  ;;  %v585_v53 = vmul.f32 %v1687_v47, %v73_v33  ;;  %v894_v63 = vmul.f32 %v2883_v1, %v73_v33  ;;  %v895_v55 = vmul.f32 %v2884_v2, %v73_v33  ;;  %v1204_v54 = vmul.f32 %v2885_v17, %v73_v33 }
 0x107   :  { %v247_v43 = vpop.permute.xlu1 %246  ;;  %v1205_v0 = vmul.f32 %v2886_v27, %v73_v33  ;;  %v2491_v5 = vadd.f32 %v2305_v61, %v119_v10  ;;  %v2494_v6 = vadd.f32 %v2308_v49, %v120_v57  ;;  %v2497_v56 = vadd.f32 %v2311_v8, %v584_v51 }
 0x108   :  { %v2459_v26 = vmul.f32 %v1944_v23, %v247_v43  ;;  %v2462_v19 = vmul.f32 %v1946_v37, %v247_v43  ;;  %v2465_v16 = vmul.f32 %v1948_v38, %v247_v43  ;;  %v2468_v25 = vmul.f32 %v1950_v39, %v247_v43 }
 0x109   :  { %v2471_v35 = vmul.f32 %v2188_v9, %v247_v43  ;;  %v2474_v62 = vmul.f32 %v2192_v18, %v247_v43  ;;  %v2477_v7 = vmul.f32 %v2196_v60, %v247_v43  ;;  %v2480_v3 = vmul.f32 %v2200_v29, %v247_v43  ;;  %2997 = vst [vmem:[#allocation26_spill] sm:$0xff] %v2491_v5 }
 0x10a   :  { %2998 = vst [vmem:[#allocation27_spill] sm:$0xff] %v2494_v6  ;;  %v2500_v58 = vadd.f32 %v2314_v13, %v585_v53  ;;  %v2503_v59 = vadd.f32 %v2317_v4, %v894_v63  ;;  %v2506_v40 = vadd.f32 %v2320_v34, %v895_v55  ;;  %v2509_v43 = vadd.f32 %v2323_v36, %v1204_v54 }
 0x10b   :  { %2999 = vst [vmem:[#allocation143_spill] sm:$0xff] %v2497_v56  ;;  %v2512_v61 = vadd.f32 %v2326_v42, %v1205_v0  ;;  %v395_v49 = vadd.f32 %v338_v14, %v311_v21  ;;  %v396_v33 = vadd.f32 %v338_v14, %v312_v32  ;;  %v704_v10 = vadd.f32 %v680_v15, %v338_v14 }
 0x10c   :  { %3000 = vst [vmem:[#allocation144_spill] sm:$0xff] %v2500_v58  ;;  %v705_v8 = vadd.f32 %v681_v50, %v338_v14  ;;  %v1014_v57 = vadd.f32 %v990_v11, %v338_v14  ;;  %v1015_v51 = vadd.f32 %v991_v30, %v338_v14  ;;  %v1324_v13 = vadd.f32 %v1300_v52, %v338_v14 }
 0x10d   :  { %3001 = vst [vmem:[#allocation145_spill] sm:$0xff] %v2503_v59  ;;  %v1325_v53 = vadd.f32 %v1301_v12, %v338_v14  ;;  %v419_v58 = vadd.f32 3.0, %v395_v49  ;;  %v420_v4 = vadd.f32 3.0, %v396_v33  ;;  %v728_v63 = vadd.f32 3.0, %v704_v10 }
 0x10e   :  { %3002 = vst [vmem:[#allocation146_spill] sm:$0xff] %v2506_v40  ;;  %v729_v59 = vadd.f32 3.0, %v705_v8  ;;  %v1038_v34 = vadd.f32 3.0, %v1014_v57  ;;  %v1039_v55 = vadd.f32 3.0, %v1015_v51  ;;  %v1348_v40 = vadd.f32 3.0, %v1324_v13 }
 0x10f   :  { %3003 = vst [vmem:[#allocation147_spill] sm:$0xff] %v2509_v43  ;;  %v1349_v36 = vadd.f32 3.0, %v1325_v53  ;;  %v443_v54 = vmax.f32 %v419_v58, 0.0  ;;  %v444_v43 = vmax.f32 %v420_v4, 0.0  ;;  %v752_v42 = vmax.f32 %v728_v63, 0.0  ;;  %v255_v5 = vpop.permute.xlu1 %254 }
 0x110   :  { %3004 = vst [vmem:[#allocation148_spill] sm:$0xff] %v2512_v61  ;;  %v753_v0 = vmax.f32 %v729_v59, 0.0  ;;  %v1062_v21 = vmax.f32 %v1038_v34, 0.0  ;;  %v1063_v32 = vmax.f32 %v1039_v55, 0.0  ;;  %v1372_v15 = vmax.f32 %v1348_v40, 0.0 }
 0x111   :  { %v1373_v50 = vmax.f32 %v1349_v36, 0.0  ;;  %v467_v11 = vmin.f32 %v443_v54, 6.0  ;;  %v468_v30 = vmin.f32 %v444_v43, 6.0  ;;  %v776_v52 = vmin.f32 %v752_v42, 6.0 }
 0x112   :  { %v777_v12 = vmin.f32 %v753_v0, 6.0  ;;  %v1086_v14 = vmin.f32 %v1062_v21, 6.0  ;;  %v1087_v61 = vmin.f32 %v1063_v32, 6.0  ;;  %v1396_v56 = vmin.f32 %v1372_v15, 6.0 }
 0x113   :  { %v1397_v6 = vmin.f32 %v1373_v50, 6.0  ;;  %v491_v20 = vmul.f32 %v467_v11, %v395_v49  ;;  %v492_v41 = vmul.f32 %v468_v30, %v396_v33  ;;  %v800_v48 = vmul.f32 %v776_v52, %v704_v10  ;;  %v88_v49 = vpop.permute.xlu0 %87  ;;  %v3008_v50 = vld [vmem:[#allocation96_spill] sm:$0xff]  ;;  %v3009_v11 = vld [vmem:[#allocation97_spill] sm:$0xff] }
 0x114   :  { %v801_v58 = vmul.f32 %v777_v12, %v705_v8  ;;  %v1110_v4 = vmul.f32 %v1086_v14, %v1014_v57  ;;  %v1111_v63 = vmul.f32 %v1087_v61, %v1015_v51  ;;  %v1420_v59 = vmul.f32 %v1396_v56, %v1324_v13  ;;  %v3012_v12 = vld [vmem:[#allocation100_spill] sm:$0xff] }
 0x115   :  { %v1421_v34 = vmul.f32 %v1397_v6, %v1325_v53  ;;  %v515_v55 = vmul.f32 0.16666667, %v491_v20  ;;  %v516_v40 = vmul.f32 0.16666667, %v492_v41  ;;  %v824_v36 = vmul.f32 0.16666667, %v800_v48 }
 0x116   :  { %v2515_v43 = vmul.f32 %v1944_v23, %v255_v5  ;;  %v825_v54 = vmul.f32 0.16666667, %v801_v58  ;;  %v1134_v42 = vmul.f32 0.16666667, %v1110_v4  ;;  %v1135_v0 = vmul.f32 0.16666667, %v1111_v63 }
 0x117   :  { %v2518_v21 = vmul.f32 %v1946_v37, %v255_v5  ;;  %539 = vst [vmem:[#allocation2] sm:$0xff] %v515_v55  ;;  %v1444_v33 = vmul.f32 0.16666667, %v1420_v59  ;;  %v1445_v10 = vmul.f32 0.16666667, %v1421_v34  ;;  %v2521_v61 = vmul.f32 %v1948_v38, %v255_v5 }
 0x118   :  { %v2524_v20 = vmul.f32 %v1950_v39, %v255_v5  ;;  %540 = vst [vmem:[#allocation2 + $0x8] sm:$0xff] %v516_v40  ;;  %v2527_v48 = vmul.f32 %v2188_v9, %v255_v5  ;;  %v2530_v41 = vmul.f32 %v2192_v18, %v255_v5  ;;  %v2533_v6 = vmul.f32 %v2196_v60, %v255_v5 }
 0x119   :  { %v2536_v56 = vmul.f32 %v2200_v29, %v255_v5  ;;  %849 = vst [vmem:[#allocation2 + $0xc0] sm:$0xff] %v824_v36  ;;  %v2539_v8 = vmul.f32 %v1681_v44, %v88_v49  ;;  %v2542_v57 = vmul.f32 %v1683_v45, %v88_v49  ;;  %v2545_v51 = vmul.f32 %v1685_v46, %v88_v49  ;;  %v353_v45 = vpop.permute.xlu2 %352 }
 0x11a   :  { %v2548_v13 = vmul.f32 %v1687_v47, %v88_v49  ;;  %850 = vst [vmem:[#allocation2 + $0xc8] sm:$0xff] %v825_v54  ;;  %v2551_v53 = vmul.f32 %v2883_v1, %v88_v49  ;;  %v2554_v5 = vmul.f32 %v2884_v2, %v88_v49  ;;  %v2557_v32 = vmul.f32 %v2885_v17, %v88_v49  ;;  %v3007_v47 = vld [vmem:[#allocation95_spill] sm:$0xff]  ;;  %v3010_v17 = vld [vmem:[#allocation98_spill] sm:$0xff] }
 0x11b   :  { %v2560_v44 = vmul.f32 %v2886_v27, %v88_v49  ;;  %1159 = vst [vmem:[#allocation2 + $0x180] sm:$0xff] %v1134_v42  ;;  %v317_v46 = vadd.f32 %v2459_v26, %v2235_v24  ;;  %v318_v15 = vadd.f32 %v2462_v19, %v3007_v47  ;;  %v686_v1 = vadd.f32 %v2465_v16, %v3008_v50  ;;  %v3011_v27 = vld [vmem:[#allocation99_spill] sm:$0xff]  ;;  %v3013_v24 = vld [vmem:[#allocation101_spill] sm:$0xff] }
 0x11c   :  { %3005 = vst [vmem:[#allocation149_spill] sm:$0xff] %v2557_v32  ;;  %v687_v2 = vadd.f32 %v2468_v25, %v3009_v11  ;;  %v996_v30 = vadd.f32 %v2471_v35, %v3010_v17  ;;  %v997_v52 = vadd.f32 %v2474_v62, %v3011_v27  ;;  %v1306_v14 = vadd.f32 %v2477_v7, %v3012_v12 }
 0x11d   :  { %3006 = vst [vmem:[#allocation150_spill] sm:$0xff] %v2560_v44  ;;  %v1307_v26 = vadd.f32 %v2480_v3, %v3013_v24  ;;  %v401_v19 = vadd.f32 %v353_v45, %v317_v46  ;;  %v402_v58 = vadd.f32 %v353_v45, %v318_v15  ;;  %v710_v16 = vadd.f32 %v686_v1, %v353_v45 }
 0x11e   :  { %1160 = vst [vmem:[#allocation2 + $0x188] sm:$0xff] %v1135_v0  ;;  %v711_v4 = vadd.f32 %v687_v2, %v353_v45  ;;  %v1020_v25 = vadd.f32 %v996_v30, %v353_v45  ;;  %v1021_v63 = vadd.f32 %v997_v52, %v353_v45  ;;  %v1330_v59 = vadd.f32 %v1306_v14, %v353_v45  ;;  %v267_v52 = vpop.permute.xlu1 %266 }
 0x11f   :  { %1469 = vst [vmem:[#allocation2 + $0x240] sm:$0xff] %v1444_v33  ;;  %v1331_v34 = vadd.f32 %v1307_v26, %v353_v45  ;;  %v425_v35 = vadd.f32 3.0, %v401_v19  ;;  %v426_v55 = vadd.f32 3.0, %v402_v58  ;;  %v734_v40 = vadd.f32 3.0, %v710_v16 }
 0x120   :  { %1470 = vst [vmem:[#allocation2 + $0x248] sm:$0xff] %v1445_v10  ;;  %v735_v62 = vadd.f32 3.0, %v711_v4  ;;  %v1044_v36 = vadd.f32 3.0, %v1020_v25  ;;  %v1045_v54 = vadd.f32 3.0, %v1021_v63  ;;  %v1354_v7 = vadd.f32 3.0, %v1330_v59 }
 0x121   :  { %v1355_v42 = vadd.f32 3.0, %v1331_v34  ;;  %v449_v0 = vmax.f32 %v425_v35, 0.0  ;;  %v450_v3 = vmax.f32 %v426_v55, 0.0  ;;  %v758_v49 = vmax.f32 %v734_v40, 0.0 }
 0x122   :  { %v759_v33 = vmax.f32 %v735_v62, 0.0  ;;  %v1068_v46 = vmax.f32 %v1044_v36, 0.0  ;;  %v1069_v47 = vmax.f32 %v1045_v54, 0.0  ;;  %v1378_v15 = vmax.f32 %v1354_v7, 0.0 }
 0x123   :  { %v1379_v10 = vmax.f32 %v1355_v42, 0.0  ;;  %v473_v50 = vmin.f32 %v449_v0, 6.0  ;;  %v474_v1 = vmin.f32 %v450_v3, 6.0  ;;  %v782_v11 = vmin.f32 %v758_v49, 6.0 }
 0x124   :  { %v783_v45 = vmin.f32 %v759_v33, 6.0  ;;  %v1092_v2 = vmin.f32 %v1068_v46, 6.0  ;;  %v1093_v17 = vmin.f32 %v1069_v47, 6.0  ;;  %v1402_v30 = vmin.f32 %v1378_v15, 6.0  ;;  %v343_v46 = vpop.permute.xlu0 %342  ;;  %v3014_v47 = vld [vmem:[#allocation111_spill] sm:$0xff] }
 0x125   :  { %v1403_v27 = vmin.f32 %v1379_v10, 6.0  ;;  %v497_v12 = vmul.f32 %v473_v50, %v401_v19  ;;  %v498_v14 = vmul.f32 %v474_v1, %v402_v58  ;;  %v806_v24 = vmul.f32 %v782_v11, %v710_v16  ;;  %v3015_v10 = vld [vmem:[#allocation112_spill] sm:$0xff]  ;;  %v3016_v1 = vld [vmem:[#allocation21_spill] sm:$0xff] }
 0x126   :  { %v807_v26 = vmul.f32 %v783_v45, %v711_v4  ;;  %v1116_v35 = vmul.f32 %v1092_v2, %v1020_v25  ;;  %v1117_v55 = vmul.f32 %v1093_v17, %v1021_v63  ;;  %v1426_v40 = vmul.f32 %v1402_v30, %v1330_v59  ;;  %v3017_v11 = vld [vmem:[#allocation113_spill] sm:$0xff]  ;;  %v3018_v2 = vld [vmem:[#allocation22_spill] sm:$0xff] }
 0x127   :  { %v1427_v62 = vmul.f32 %v1403_v27, %v1331_v34  ;;  %v521_v36 = vmul.f32 0.16666667, %v497_v12  ;;  %v522_v54 = vmul.f32 0.16666667, %v498_v14  ;;  %v830_v7 = vmul.f32 0.16666667, %v806_v24 }
 0x128   :  { %v2579_v42 = vmul.f32 %v1944_v23, %v267_v52  ;;  %v831_v0 = vmul.f32 0.16666667, %v807_v26  ;;  %v1140_v3 = vmul.f32 0.16666667, %v1116_v35  ;;  %v1141_v49 = vmul.f32 0.16666667, %v1117_v55 }
 0x129   :  { %v2582_v33 = vmul.f32 %v1946_v37, %v267_v52  ;;  %545 = vst [vmem:[#allocation2 + $0x30] sm:$0xff] %v521_v36  ;;  %v1450_v19 = vmul.f32 0.16666667, %v1426_v40  ;;  %v1451_v58 = vmul.f32 0.16666667, %v1427_v62  ;;  %v2585_v16 = vmul.f32 %v1948_v38, %v267_v52  ;;  %v3019_v17 = vld [vmem:[#allocation114_spill] sm:$0xff] }
 0x12a   :  { %v2588_v4 = vmul.f32 %v1950_v39, %v267_v52  ;;  %546 = vst [vmem:[#allocation2 + $0x38] sm:$0xff] %v522_v54  ;;  %v2591_v25 = vmul.f32 %v2188_v9, %v267_v52  ;;  %v2594_v63 = vmul.f32 %v2192_v18, %v267_v52  ;;  %v2597_v59 = vmul.f32 %v2196_v60, %v267_v52  ;;  %v3020_v27 = vld [vmem:[#allocation115_spill] sm:$0xff]  ;;  %v3022_v14 = vld [vmem:[#allocation116_spill] sm:$0xff]  ;;  %v3024_v35 = vld [vmem:[#allocation117_spill] sm:$0xff] }
 0x12b   :  { %v2600_v34 = vmul.f32 %v2200_v29, %v267_v52  ;;  %855 = vst [vmem:[#allocation2 + $0xf0] sm:$0xff] %v830_v7  ;;  %v313_v15 = vadd.f32 %v3014_v47, %v2435_v28  ;;  %v314_v50 = vadd.f32 %v3015_v10, %v2438_v22  ;;  %v682_v45 = vadd.f32 %v3017_v11, %v3016_v1  ;;  %v3021_v52 = vld [vmem:[#allocation23_spill] sm:$0xff]  ;;  %v3023_v26 = vld [vmem:[#allocation24_spill] sm:$0xff]  ;;  %v3025_v28 = vld [vmem:[#allocation25_spill] sm:$0xff] }
 0x12c   :  { %v683_v30 = vadd.f32 %v3019_v17, %v3018_v2  ;;  %856 = vst [vmem:[#allocation2 + $0xf8] sm:$0xff] %v831_v0  ;;  %v992_v12 = vadd.f32 %v3020_v27, %v2447_v31  ;;  %v993_v24 = vadd.f32 %v3022_v14, %v3021_v52  ;;  %v1302_v55 = vadd.f32 %v3024_v35, %v3023_v26  ;;  %v3026_v40 = vld [vmem:[#allocation118_spill] sm:$0xff] }
 0x12d   :  { %v1303_v62 = vadd.f32 %v3026_v40, %v3025_v28  ;;  %1165 = vst [vmem:[#allocation2 + $0x1b0] sm:$0xff] %v1140_v3  ;;  %v397_v22 = vadd.f32 %v343_v46, %v313_v15  ;;  %v398_v36 = vadd.f32 %v343_v46, %v314_v50  ;;  %v706_v54 = vadd.f32 %v682_v45, %v343_v46 }
 0x12e   :  { %v707_v7 = vadd.f32 %v683_v30, %v343_v46  ;;  %1166 = vst [vmem:[#allocation2 + $0x1b8] sm:$0xff] %v1141_v49  ;;  %v1016_v47 = vadd.f32 %v992_v12, %v343_v46  ;;  %v1017_v0 = vadd.f32 %v993_v24, %v343_v46  ;;  %v1326_v10 = vadd.f32 %v1302_v55, %v343_v46 }
 0x12f   :  { %v1327_v1 = vadd.f32 %v1303_v62, %v343_v46  ;;  %1475 = vst [vmem:[#allocation2 + $0x270] sm:$0xff] %v1450_v19  ;;  %v421_v31 = vadd.f32 3.0, %v397_v22  ;;  %v422_v11 = vadd.f32 3.0, %v398_v36  ;;  %v730_v2 = vadd.f32 3.0, %v706_v54 }
 0x130   :  { %v731_v17 = vadd.f32 3.0, %v707_v7  ;;  %1476 = vst [vmem:[#allocation2 + $0x278] sm:$0xff] %v1451_v58  ;;  %v1040_v27 = vadd.f32 3.0, %v1016_v47  ;;  %v1041_v52 = vadd.f32 3.0, %v1017_v0  ;;  %v1350_v14 = vadd.f32 3.0, %v1326_v10 }
 0x131   :  { %v1351_v26 = vadd.f32 3.0, %v1327_v1  ;;  %v445_v3 = vmax.f32 %v421_v31, 0.0  ;;  %v446_v15 = vmax.f32 %v422_v11, 0.0  ;;  %v754_v50 = vmax.f32 %v730_v2, 0.0 }
 0x132   :  { %v755_v45 = vmax.f32 %v731_v17, 0.0  ;;  %v1064_v30 = vmax.f32 %v1040_v27, 0.0  ;;  %v1065_v49 = vmax.f32 %v1041_v52, 0.0  ;;  %v1374_v12 = vmax.f32 %v1350_v14, 0.0  ;;  %v363_v27 = vpop.permute.xlu2 %362 }
 0x133   :  { %v1375_v24 = vmax.f32 %v1351_v26, 0.0  ;;  %v469_v35 = vmin.f32 %v445_v3, 6.0  ;;  %v470_v46 = vmin.f32 %v446_v15, 6.0  ;;  %v778_v19 = vmin.f32 %v754_v50, 6.0  ;;  %v3027_v3 = vld [vmem:[#allocation28_spill] sm:$0xff] }
 0x134   :  { %v779_v55 = vmin.f32 %v755_v45, 6.0  ;;  %v1088_v28 = vmin.f32 %v1064_v30, 6.0  ;;  %v1089_v40 = vmin.f32 %v1065_v49, 6.0  ;;  %v1398_v62 = vmin.f32 %v1374_v12, 6.0  ;;  %v3028_v49 = vld [vmem:[#allocation29_spill] sm:$0xff] }
 0x135   :  { %v1399_v58 = vmin.f32 %v1375_v24, 6.0  ;;  %v493_v29 = vmul.f32 %v469_v35, %v397_v22  ;;  %v494_v60 = vmul.f32 %v470_v46, %v398_v36  ;;  %v802_v44 = vmul.f32 %v778_v19, %v706_v54  ;;  %v3033_v24 = vld [vmem:[#allocation34_spill] sm:$0xff]  ;;  %v3034_v46 = vld [vmem:[#allocation35_spill] sm:$0xff] }
 0x136   :  { %v803_v32 = vmul.f32 %v779_v55, %v707_v7  ;;  %v1112_v31 = vmul.f32 %v1088_v28, %v1016_v47  ;;  %v1113_v11 = vmul.f32 %v1089_v40, %v1017_v0  ;;  %v1422_v2 = vmul.f32 %v1398_v62, %v1326_v10  ;;  %v3029_v47 = vld [vmem:[#allocation30_spill] sm:$0xff]  ;;  %v3031_v10 = vld [vmem:[#allocation32_spill] sm:$0xff] }
 0x137   :  { %v1423_v17 = vmul.f32 %v1399_v58, %v1327_v1  ;;  %v517_v52 = vmul.f32 0.16666667, %v493_v29  ;;  %v518_v14 = vmul.f32 0.16666667, %v494_v60  ;;  %v826_v26 = vmul.f32 0.16666667, %v802_v44 }
 0x138   :  { %v321_v15 = vadd.f32 %v2515_v43, %v3027_v3  ;;  %v827_v50 = vmul.f32 0.16666667, %v803_v32  ;;  %v1136_v45 = vmul.f32 0.16666667, %v1112_v31  ;;  %v1137_v30 = vmul.f32 0.16666667, %v1113_v11 }
 0x139   :  { %v322_v22 = vadd.f32 %v2518_v21, %v3028_v49  ;;  %541 = vst [vmem:[#allocation2 + $0x10] sm:$0xff] %v517_v52  ;;  %v1446_v36 = vmul.f32 0.16666667, %v1422_v2  ;;  %v1447_v54 = vmul.f32 0.16666667, %v1423_v17  ;;  %v690_v0 = vadd.f32 %v2521_v61, %v3029_v47  ;;  %v3030_v60 = vld [vmem:[#allocation31_spill] sm:$0xff] }
 0x13a   :  { %v405_v7 = vadd.f32 %v363_v27, %v321_v15  ;;  %542 = vst [vmem:[#allocation2 + $0x18] sm:$0xff] %v518_v14  ;;  %v691_v44 = vadd.f32 %v2524_v20, %v3030_v60  ;;  %v1000_v43 = vadd.f32 %v2527_v48, %v3031_v10  ;;  %v3032_v32 = vld [vmem:[#allocation33_spill] sm:$0xff]  ;;  %v1310_v35 = vadd.f32 %v2533_v6, %v3033_v24 }
 0x13b   :  { %v406_v29 = vadd.f32 %v363_v27, %v322_v22  ;;  %v1001_v1 = vadd.f32 %v2530_v41, %v3032_v32  ;;  %851 = vst [vmem:[#allocation2 + $0xd0] sm:$0xff] %v826_v26  ;;  %v714_v12 = vadd.f32 %v690_v0, %v363_v27  ;;  %v1311_v61 = vadd.f32 %v2536_v56, %v3034_v46  ;;  %v3036_v46 = vld [vmem:[#allocation135_spill] sm:$0xff] }
 0x13c   :  { %v429_v21 = vadd.f32 3.0, %v405_v7  ;;  %852 = vst [vmem:[#allocation2 + $0xd8] sm:$0xff] %v827_v50  ;;  %v715_v55 = vadd.f32 %v691_v44, %v363_v27  ;;  %v1024_v28 = vadd.f32 %v1000_v43, %v363_v27  ;;  %v1334_v62 = vadd.f32 %v1310_v35, %v363_v27 }
 0x13d   :  { %v430_v19 = vadd.f32 3.0, %v406_v29  ;;  %v1025_v20 = vadd.f32 %v1001_v1, %v363_v27  ;;  %1161 = vst [vmem:[#allocation2 + $0x190] sm:$0xff] %v1136_v45  ;;  %v738_v48 = vadd.f32 3.0, %v714_v12  ;;  %v1335_v58 = vadd.f32 %v1311_v61, %v363_v27 }
 0x13e   :  { %v453_v40 = vmax.f32 %v429_v21, 0.0  ;;  %1162 = vst [vmem:[#allocation2 + $0x198] sm:$0xff] %v1137_v30  ;;  %v739_v31 = vadd.f32 3.0, %v715_v55  ;;  %v1048_v11 = vadd.f32 3.0, %v1024_v28  ;;  %v1358_v52 = vadd.f32 3.0, %v1334_v62 }
 0x13f   :  { %v454_v41 = vmax.f32 %v430_v19, 0.0  ;;  %v1049_v2 = vadd.f32 3.0, %v1025_v20  ;;  %1471 = vst [vmem:[#allocation2 + $0x250] sm:$0xff] %v1446_v36  ;;  %v762_v17 = vmax.f32 %v738_v48, 0.0  ;;  %v1359_v56 = vadd.f32 3.0, %v1335_v58  ;;  %v3038_v48 = vld [vmem:[#allocation136_spill] sm:$0xff] }
 0x140   :  { %v477_v6 = vmin.f32 %v453_v40, 6.0  ;;  %1472 = vst [vmem:[#allocation2 + $0x258] sm:$0xff] %v1447_v54  ;;  %v763_v26 = vmax.f32 %v739_v31, 0.0  ;;  %v1072_v3 = vmax.f32 %v1048_v11, 0.0  ;;  %v1382_v49 = vmax.f32 %v1358_v52, 0.0  ;;  %v3037_v40 = vld [vmem:[#allocation27_spill] sm:$0xff] }
 0x141   :  { %v478_v14 = vmin.f32 %v454_v41, 6.0  ;;  %v1073_v15 = vmax.f32 %v1049_v2, 0.0  ;;  %v786_v45 = vmin.f32 %v762_v17, 6.0  ;;  %v1383_v22 = vmax.f32 %v1359_v56, 0.0  ;;  %v3040_v31 = vld [vmem:[#allocation137_spill] sm:$0xff]  ;;  %v368_v2 = vpop.permute.xlu0 %367  ;;  %v3044_v17 = vld [vmem:[#allocation139_spill] sm:$0xff] }
 0x142   :  { %v501_v50 = vmul.f32 %v477_v6, %v405_v7  ;;  %v787_v30 = vmin.f32 %v763_v26, 6.0  ;;  %v1096_v47 = vmin.f32 %v1072_v3, 6.0  ;;  %v1406_v36 = vmin.f32 %v1382_v49, 6.0  ;;  %v3035_v7 = vld [vmem:[#allocation26_spill] sm:$0xff]  ;;  %v3046_v26 = vld [vmem:[#allocation140_spill] sm:$0xff] }
 0x143   :  { %v502_v27 = vmul.f32 %v478_v14, %v406_v29  ;;  %v1097_v0 = vmin.f32 %v1073_v15, 6.0  ;;  %v810_v44 = vmul.f32 %v786_v45, %v714_v12  ;;  %v1407_v10 = vmin.f32 %v1383_v22, 6.0  ;;  %v3039_v12 = vld [vmem:[#allocation143_spill] sm:$0xff]  ;;  %v3042_v6 = vld [vmem:[#allocation138_spill] sm:$0xff]  ;;  %v3049_v49 = vld [vmem:[#allocation148_spill] sm:$0xff] }
 0x144   :  { %v525_v60 = vmul.f32 0.16666667, %v501_v50  ;;  %v811_v32 = vmul.f32 %v787_v30, %v715_v55  ;;  %v1120_v1 = vmul.f32 %v1096_v47, %v1024_v28  ;;  %v1430_v24 = vmul.f32 %v1406_v36, %v1334_v62  ;;  %v3045_v14 = vld [vmem:[#allocation146_spill] sm:$0xff]  ;;  %v3047_v15 = vld [vmem:[#allocation147_spill] sm:$0xff]  ;;  %v3048_v50 = vld [vmem:[#allocation141_spill] sm:$0xff] }
 0x145   :  { %v526_v43 = vmul.f32 0.16666667, %v502_v27  ;;  %v1121_v54 = vmul.f32 %v1097_v0, %v1025_v20  ;;  %v834_v21 = vmul.f32 0.16666667, %v810_v44  ;;  %v1431_v35 = vmul.f32 %v1407_v10, %v1335_v58  ;;  %v3041_v20 = vld [vmem:[#allocation144_spill] sm:$0xff]  ;;  %v3043_v58 = vld [vmem:[#allocation145_spill] sm:$0xff] }
 0x146   :  { %549 = vst [vmem:[#allocation2 + $0x50] sm:$0xff] %v525_v60  ;;  %v323_v61 = vadd.f32 %v3036_v46, %v3035_v7  ;;  %v835_v29 = vmul.f32 0.16666667, %v811_v32  ;;  %v1144_v19 = vmul.f32 0.16666667, %v1120_v1  ;;  %v324_v41 = vadd.f32 %v3038_v48, %v3037_v40  ;;  %v3050_v22 = vld [vmem:[#allocation142_spill] sm:$0xff] }
 0x147   :  { %550 = vst [vmem:[#allocation2 + $0x58] sm:$0xff] %v526_v43  ;;  %v692_v11 = vadd.f32 %v3040_v31, %v3039_v12  ;;  %v1145_v55 = vmul.f32 0.16666667, %v1121_v54  ;;  %v1454_v28 = vmul.f32 0.16666667, %v1430_v24  ;;  %v693_v62 = vadd.f32 %v3042_v6, %v3041_v20 }
 0x148   :  { %859 = vst [vmem:[#allocation2 + $0x110] sm:$0xff] %v834_v21  ;;  %v1002_v52 = vadd.f32 %v3044_v17, %v3043_v58  ;;  %v1455_v56 = vmul.f32 0.16666667, %v1431_v35  ;;  %v1003_v3 = vadd.f32 %v3046_v26, %v3045_v14  ;;  %v1312_v45 = vadd.f32 %v3048_v50, %v3047_v15 }
 0x149   :  { %860 = vst [vmem:[#allocation2 + $0x118] sm:$0xff] %v835_v29  ;;  %v1313_v27 = vadd.f32 %v3050_v22, %v3049_v49  ;;  %v407_v30 = vadd.f32 %v368_v2, %v323_v61  ;;  %v408_v47 = vadd.f32 %v368_v2, %v324_v41  ;;  %v716_v0 = vadd.f32 %v692_v11, %v368_v2 }
 0x14a   :  { %1169 = vst [vmem:[#allocation2 + $0x1d0] sm:$0xff] %v1144_v19  ;;  %v717_v60 = vadd.f32 %v693_v62, %v368_v2  ;;  %v1026_v44 = vadd.f32 %v1002_v52, %v368_v2  ;;  %v1027_v36 = vadd.f32 %v1003_v3, %v368_v2  ;;  %v1336_v10 = vadd.f32 %v1312_v45, %v368_v2  ;;  %v378_v45 = vpop.permute.xlu2 %377 }
 0x14b   :  { %1170 = vst [vmem:[#allocation2 + $0x1d8] sm:$0xff] %v1145_v55  ;;  %v1337_v43 = vadd.f32 %v1313_v27, %v368_v2  ;;  %v431_v32 = vadd.f32 3.0, %v407_v30  ;;  %v432_v1 = vadd.f32 3.0, %v408_v47  ;;  %v740_v54 = vadd.f32 3.0, %v716_v0 }
 0x14c   :  { %1479 = vst [vmem:[#allocation2 + $0x290] sm:$0xff] %v1454_v28  ;;  %v741_v21 = vadd.f32 3.0, %v717_v60  ;;  %v1050_v24 = vadd.f32 3.0, %v1026_v44  ;;  %v1051_v35 = vadd.f32 3.0, %v1027_v36  ;;  %v1360_v7 = vadd.f32 3.0, %v1336_v10 }
 0x14d   :  { %1480 = vst [vmem:[#allocation2 + $0x298] sm:$0xff] %v1455_v56  ;;  %v1361_v46 = vadd.f32 3.0, %v1337_v43  ;;  %v455_v29 = vmax.f32 %v431_v32, 0.0  ;;  %v456_v61 = vmax.f32 %v432_v1, 0.0  ;;  %v764_v19 = vmax.f32 %v740_v54, 0.0  ;;  %v3051_v32 = vld [vmem:[#allocation44_spill] sm:$0xff] }
 0x14e   :  { %v765_v40 = vmax.f32 %v741_v21, 0.0  ;;  %v1074_v48 = vmax.f32 %v1050_v24, 0.0  ;;  %v1075_v41 = vmax.f32 %v1051_v35, 0.0  ;;  %v1384_v12 = vmax.f32 %v1360_v7, 0.0  ;;  %v3052_v35 = vld [vmem:[#allocation45_spill] sm:$0xff] }
 0x14f   :  { %v1385_v31 = vmax.f32 %v1361_v46, 0.0  ;;  %v479_v11 = vmin.f32 %v455_v29, 6.0  ;;  %v480_v2 = vmin.f32 %v456_v61, 6.0  ;;  %v788_v55 = vmin.f32 %v764_v19, 6.0  ;;  %v3055_v46 = vld [vmem:[#allocation48_spill] sm:$0xff]  ;;  %v3056_v29 = vld [vmem:[#allocation49_spill] sm:$0xff] }
 0x150   :  { %v789_v28 = vmin.f32 %v765_v40, 6.0  ;;  %v1098_v20 = vmin.f32 %v1074_v48, 6.0  ;;  %v1099_v6 = vmin.f32 %v1075_v41, 6.0  ;;  %v1408_v62 = vmin.f32 %v1384_v12, 6.0  ;;  %v3057_v40 = vld [vmem:[#allocation50_spill] sm:$0xff]  ;;  %v3058_v41 = vld [vmem:[#allocation51_spill] sm:$0xff] }
 0x151   :  { %v1409_v58 = vmin.f32 %v1385_v31, 6.0  ;;  %v503_v17 = vmul.f32 %v479_v11, %v407_v30  ;;  %v504_v52 = vmul.f32 %v480_v2, %v408_v47  ;;  %v812_v56 = vmul.f32 %v788_v55, %v716_v0 }
 0x152   :  { %v813_v14 = vmul.f32 %v789_v28, %v717_v60  ;;  %v1122_v26 = vmul.f32 %v1098_v20, %v1026_v44  ;;  %v1123_v3 = vmul.f32 %v1099_v6, %v1027_v36  ;;  %v1432_v15 = vmul.f32 %v1408_v62, %v1336_v10  ;;  %v3053_v44 = vld [vmem:[#allocation46_spill] sm:$0xff] }
 0x153   :  { %v1433_v50 = vmul.f32 %v1409_v58, %v1337_v43  ;;  %v527_v49 = vmul.f32 0.16666667, %v503_v17  ;;  %v528_v22 = vmul.f32 0.16666667, %v504_v52  ;;  %v836_v27 = vmul.f32 0.16666667, %v812_v56 }
 0x154   :  { %v327_v1 = vadd.f32 %v2579_v42, %v3051_v32  ;;  %v837_v54 = vmul.f32 0.16666667, %v813_v14  ;;  %v1146_v21 = vmul.f32 0.16666667, %v1122_v26  ;;  %v1147_v24 = vmul.f32 0.16666667, %v1123_v3 }
 0x155   :  { %v328_v30 = vadd.f32 %v2582_v33, %v3052_v35  ;;  %551 = vst [vmem:[#allocation2 + $0x60] sm:$0xff] %v527_v49  ;;  %v1456_v47 = vmul.f32 0.16666667, %v1432_v15  ;;  %v1457_v0 = vmul.f32 0.16666667, %v1433_v50  ;;  %v696_v36 = vadd.f32 %v2585_v16, %v3053_v44  ;;  %v3054_v43 = vld [vmem:[#allocation47_spill] sm:$0xff] }
 0x156   :  { %v411_v60 = vadd.f32 %v378_v45, %v327_v1  ;;  %552 = vst [vmem:[#allocation2 + $0x68] sm:$0xff] %v528_v22  ;;  %v697_v7 = vadd.f32 %v2588_v4, %v3054_v43  ;;  %v1006_v42 = vadd.f32 %v2591_v25, %v3055_v46  ;;  %v1007_v61 = vadd.f32 %v2594_v63, %v3056_v29 }
 0x157   :  { %v412_v10 = vadd.f32 %v378_v45, %v328_v30  ;;  %861 = vst [vmem:[#allocation2 + $0x120] sm:$0xff] %v836_v27  ;;  %v720_v19 = vadd.f32 %v696_v36, %v378_v45  ;;  %v1316_v48 = vadd.f32 %v2597_v59, %v3057_v40  ;;  %v1317_v16 = vadd.f32 %v2600_v34, %v3058_v41  ;;  %v3062_v41 = vld [vmem:[#allocation125_spill] sm:$0xff] }
 0x158   :  { %v435_v33 = vadd.f32 3.0, %v411_v60  ;;  %862 = vst [vmem:[#allocation2 + $0x128] sm:$0xff] %v837_v54  ;;  %v721_v31 = vadd.f32 %v697_v7, %v378_v45  ;;  %v1030_v11 = vadd.f32 %v1006_v42, %v378_v45  ;;  %v1031_v4 = vadd.f32 %v1007_v61, %v378_v45  ;;  %v3060_v42 = vld [vmem:[#allocation124_spill] sm:$0xff] }
 0x159   :  { %v436_v12 = vadd.f32 3.0, %v412_v10  ;;  %1171 = vst [vmem:[#allocation2 + $0x1e0] sm:$0xff] %v1146_v21  ;;  %v744_v25 = vadd.f32 3.0, %v720_v19  ;;  %v1340_v55 = vadd.f32 %v1316_v48, %v378_v45  ;;  %v1341_v28 = vadd.f32 %v1317_v16, %v378_v45  ;;  %v3061_v61 = vld [vmem:[#allocation20_spill] sm:$0xff] }
 0x15a   :  { %v459_v2 = vmax.f32 %v435_v33, 0.0  ;;  %1172 = vst [vmem:[#allocation2 + $0x1e8] sm:$0xff] %v1147_v24  ;;  %v745_v20 = vadd.f32 3.0, %v721_v31  ;;  %v1054_v6 = vadd.f32 3.0, %v1030_v11  ;;  %v1055_v62 = vadd.f32 3.0, %v1031_v4 }
 0x15b   :  { %v460_v63 = vmax.f32 %v436_v12, 0.0  ;;  %1481 = vst [vmem:[#allocation2 + $0x2a0] sm:$0xff] %v1456_v47  ;;  %v768_v58 = vmax.f32 %v744_v25, 0.0  ;;  %v1364_v17 = vadd.f32 3.0, %v1340_v55  ;;  %v1365_v34 = vadd.f32 3.0, %v1341_v28  ;;  %v3064_v25 = vld [vmem:[#allocation127_spill] sm:$0xff] }
 0x15c   :  { %v483_v59 = vmin.f32 %v459_v2, 6.0  ;;  %1482 = vst [vmem:[#allocation2 + $0x2a8] sm:$0xff] %v1457_v0  ;;  %v769_v56 = vmax.f32 %v745_v20, 0.0  ;;  %v1078_v14 = vmax.f32 %v1054_v6, 0.0  ;;  %v1079_v26 = vmax.f32 %v1055_v62, 0.0  ;;  %v3066_v62 = vld [vmem:[#allocation149_spill] sm:$0xff] }
 0x15d   :  { %v484_v52 = vmin.f32 %v460_v63, 6.0  ;;  %v792_v15 = vmin.f32 %v768_v58, 6.0  ;;  %v1388_v50 = vmax.f32 %v1364_v17, 0.0  ;;  %v1389_v49 = vmax.f32 %v1365_v34, 0.0  ;;  %v383_v63 = vpop.permute.xlu0 %382  ;;  %v3068_v34 = vld [vmem:[#allocation150_spill] sm:$0xff] }
 0x15e   :  { %v507_v3 = vmul.f32 %v483_v59, %v411_v60  ;;  %v793_v22 = vmin.f32 %v769_v56, 6.0  ;;  %v1102_v27 = vmin.f32 %v1078_v14, 6.0  ;;  %v1103_v32 = vmin.f32 %v1079_v26, 6.0  ;;  %v3059_v60 = vld [vmem:[#allocation123_spill] sm:$0xff]  ;;  %v3067_v59 = vld [vmem:[#allocation129_spill] sm:$0xff]  ;;  %v3071_v14 = vld [vmem:[#allocation6_spill] sm:$0xff] }
 0x15f   :  { %v508_v45 = vmul.f32 %v484_v52, %v412_v10  ;;  %v816_v54 = vmul.f32 %v792_v15, %v720_v19  ;;  %v1412_v21 = vmin.f32 %v1388_v50, 6.0  ;;  %v1413_v24 = vmin.f32 %v1389_v49, 6.0  ;;  %v3069_v52 = vld [vmem:[#allocation130_spill] sm:$0xff]  ;;  %v3070_v56 = vld [vmem:[#allocation5_spill] sm:$0xff] }
 0x160   :  { %v531_v1 = vmul.f32 0.16666667, %v507_v3  ;;  %v817_v30 = vmul.f32 %v793_v22, %v721_v31  ;;  %v1126_v47 = vmul.f32 %v1102_v27, %v1030_v11  ;;  %v1127_v0 = vmul.f32 %v1103_v32, %v1031_v4  ;;  %v3063_v31 = vld [vmem:[#allocation126_spill] sm:$0xff] }
 0x161   :  { %v532_v35 = vmul.f32 0.16666667, %v508_v45  ;;  %v840_v44 = vmul.f32 0.16666667, %v816_v54  ;;  %v1436_v36 = vmul.f32 %v1412_v21, %v1340_v55  ;;  %v1437_v43 = vmul.f32 %v1413_v24, %v1341_v28  ;;  %v3065_v28 = vld [vmem:[#allocation128_spill] sm:$0xff] }
 0x162   :  { %555 = vst [vmem:[#allocation2 + $0x80] sm:$0xff] %v531_v1  ;;  %v227_v7 = vadd.f32 %v3059_v60, %v2539_v8  ;;  %v841_v10 = vmul.f32 0.16666667, %v817_v30  ;;  %v1150_v46 = vmul.f32 0.16666667, %v1126_v47  ;;  %v228_v29 = vadd.f32 %v3060_v42, %v2542_v57 }
 0x163   :  { %556 = vst [vmem:[#allocation2 + $0x88] sm:$0xff] %v532_v35  ;;  %v305_v33 = vmul.f32 %v1944_v23, %v3061_v61  ;;  %v1151_v19 = vmul.f32 0.16666667, %v1127_v0  ;;  %v1460_v40 = vmul.f32 0.16666667, %v1436_v36  ;;  %v306_v48 = vmul.f32 %v1946_v37, %v3061_v61 }
 0x164   :  { %865 = vst [vmem:[#allocation2 + $0x140] sm:$0xff] %v840_v44  ;;  %v644_v16 = vadd.f32 %v3062_v41, %v2545_v51  ;;  %v1461_v8 = vmul.f32 0.16666667, %v1437_v43  ;;  %v645_v11 = vadd.f32 %v3063_v31, %v2548_v13  ;;  %v674_v57 = vmul.f32 %v1948_v38, %v3061_v61 }
 0x165   :  { %866 = vst [vmem:[#allocation2 + $0x148] sm:$0xff] %v841_v10  ;;  %v329_v12 = vadd.f32 %v305_v33, %v227_v7  ;;  %v330_v4 = vadd.f32 %v306_v48, %v228_v29  ;;  %v675_v2 = vmul.f32 %v1950_v39, %v3061_v61  ;;  %v954_v55 = vadd.f32 %v3064_v25, %v2551_v53 }
 0x166   :  { %1175 = vst [vmem:[#allocation2 + $0x200] sm:$0xff] %v1150_v46  ;;  %v955_v51 = vadd.f32 %v3065_v28, %v2554_v5  ;;  %v698_v20 = vadd.f32 %v674_v57, %v644_v16  ;;  %v984_v13 = vmul.f32 %v2188_v9, %v3061_v61  ;;  %v985_v6 = vmul.f32 %v2192_v18, %v3061_v61 }
 0x167   :  { %1176 = vst [vmem:[#allocation2 + $0x208] sm:$0xff] %v1151_v19  ;;  %v1264_v58 = vadd.f32 %v3067_v59, %v3066_v62  ;;  %v699_v17 = vadd.f32 %v675_v2, %v645_v11  ;;  %v1265_v53 = vadd.f32 %v3069_v52, %v3068_v34  ;;  %v1294_v5 = vmul.f32 %v3070_v56, %v3061_v61  ;;  %v3072_v34 = vld [vmem:[#allocation12_spill] sm:$0xff]  ;;  %v3073_v52 = vld [vmem:[#allocation7_spill] sm:$0xff] }
 0x168   :  { %1485 = vst [vmem:[#allocation2 + $0x2c0] sm:$0xff] %v1460_v40  ;;  %v1295_v26 = vmul.f32 %v3071_v14, %v3061_v61  ;;  %v1008_v3 = vadd.f32 %v984_v13, %v954_v55  ;;  %v1009_v15 = vadd.f32 %v985_v6, %v955_v51  ;;  %v413_v50 = vadd.f32 %v383_v63, %v329_v12  ;;  %v279_v55 = vpop.permute.xlu1 %278 }
 0x169   :  { %1486 = vst [vmem:[#allocation2 + $0x2c8] sm:$0xff] %v1461_v8  ;;  %v414_v49 = vadd.f32 %v383_v63, %v330_v4  ;;  %v1318_v45 = vadd.f32 %v1294_v5, %v1264_v58  ;;  %v722_v27 = vadd.f32 %v698_v20, %v383_v63  ;;  %v723_v32 = vadd.f32 %v699_v17, %v383_v63  ;;  %v3074_v5 = vld [vmem:[#allocation13_spill] sm:$0xff] }
 0x16a   :  { %v1319_v22 = vadd.f32 %v1295_v26, %v1265_v53  ;;  %v437_v1 = vadd.f32 3.0, %v413_v50  ;;  %v1032_v21 = vadd.f32 %v1008_v3, %v383_v63  ;;  %v1033_v24 = vadd.f32 %v1009_v15, %v383_v63  ;;  %v3075_v26 = vld [vmem:[#allocation8_spill] sm:$0xff] }
 0x16b   :  { %v438_v54 = vadd.f32 3.0, %v414_v49  ;;  %v746_v35 = vadd.f32 3.0, %v722_v27  ;;  %v747_v30 = vadd.f32 3.0, %v723_v32  ;;  %v1342_v47 = vadd.f32 %v1318_v45, %v383_v63 }
 0x16c   :  { %v1343_v0 = vadd.f32 %v1319_v22, %v383_v63  ;;  %v461_v44 = vmax.f32 %v437_v1, 0.0  ;;  %v1056_v43 = vadd.f32 3.0, %v1032_v21  ;;  %v1057_v60 = vadd.f32 3.0, %v1033_v24  ;;  %v393_v22 = vpop.permute.xlu2 %392 }
 0x16d   :  { %v462_v36 = vmax.f32 %v438_v54, 0.0  ;;  %v770_v7 = vmax.f32 %v746_v35, 0.0  ;;  %v771_v10 = vmax.f32 %v747_v30, 0.0  ;;  %v1366_v46 = vadd.f32 3.0, %v1342_v47  ;;  %v3078_v54 = vld [vmem:[#allocation15_spill] sm:$0xff] }
 0x16e   :  { %v1367_v42 = vadd.f32 3.0, %v1343_v0  ;;  %v485_v29 = vmin.f32 %v461_v44, 6.0  ;;  %v1080_v33 = vmax.f32 %v1056_v43, 0.0  ;;  %v1081_v19 = vmax.f32 %v1057_v60, 0.0  ;;  %v3080_v44 = vld [vmem:[#allocation16_spill] sm:$0xff]  ;;  %v3082_v60 = vld [vmem:[#allocation17_spill] sm:$0xff] }
 0x16f   :  { %v486_v61 = vmin.f32 %v462_v36, 6.0  ;;  %v794_v40 = vmin.f32 %v770_v7, 6.0  ;;  %v795_v48 = vmin.f32 %v771_v10, 6.0  ;;  %v1390_v41 = vmax.f32 %v1366_v46, 0.0  ;;  %v3081_v36 = vld [vmem:[#allocation59_spill] sm:$0xff]  ;;  %v3083_v7 = vld [vmem:[#allocation60_spill] sm:$0xff] }
 0x170   :  { %v1391_v16 = vmax.f32 %v1367_v42, 0.0  ;;  %v509_v8 = vmul.f32 %v485_v29, %v413_v50  ;;  %v1104_v31 = vmin.f32 %v1080_v33, 6.0  ;;  %v1105_v11 = vmin.f32 %v1081_v19, 6.0 }
 0x171   :  { %v510_v12 = vmul.f32 %v486_v61, %v414_v49  ;;  %v818_v57 = vmul.f32 %v794_v40, %v722_v27  ;;  %v819_v4 = vmul.f32 %v795_v48, %v723_v32  ;;  %v1414_v2 = vmin.f32 %v1390_v41, 6.0  ;;  %v3076_v27 = vld [vmem:[#allocation14_spill] sm:$0xff]  ;;  %v3077_v32 = vld [vmem:[#allocation9_spill] sm:$0xff] }
 0x172   :  { %v1415_v25 = vmin.f32 %v1391_v16, 6.0  ;;  %v533_v28 = vmul.f32 0.16666667, %v509_v8  ;;  %v1128_v63 = vmul.f32 %v1104_v31, %v1032_v21  ;;  %v1129_v20 = vmul.f32 %v1105_v11, %v1033_v24  ;;  %v3079_v21 = vld [vmem:[#allocation10_spill] sm:$0xff]  ;;  %v3085_v48 = vld [vmem:[#allocation61_spill] sm:$0xff]  ;;  %v3086_v16 = vld [vmem:[#allocation19_spill] sm:$0xff] }
 0x173   :  { %v534_v51 = vmul.f32 0.16666667, %v510_v12  ;;  %v842_v13 = vmul.f32 0.16666667, %v818_v57  ;;  %v843_v6 = vmul.f32 0.16666667, %v819_v4  ;;  %v1438_v62 = vmul.f32 %v1414_v2, %v1342_v47 }
 0x174   :  { %v1439_v59 = vmul.f32 %v1415_v25, %v1343_v0  ;;  %557 = vst [vmem:[#allocation2 + $0x90] sm:$0xff] %v533_v28  ;;  %v1152_v58 = vmul.f32 0.16666667, %v1128_v63  ;;  %v1153_v17 = vmul.f32 0.16666667, %v1129_v20  ;;  %v231_v53 = vadd.f32 %v3073_v52, %v3072_v34  ;;  %v3084_v40 = vld [vmem:[#allocation18_spill] sm:$0xff] }
 0x175   :  { %v232_v3 = vadd.f32 %v3075_v26, %v3074_v5  ;;  %558 = vst [vmem:[#allocation2 + $0x98] sm:$0xff] %v534_v51  ;;  %v1462_v15 = vmul.f32 0.16666667, %v1438_v62  ;;  %v309_v49 = vmul.f32 %v1944_v23, %v279_v55  ;;  %v310_v45 = vmul.f32 %v1946_v37, %v279_v55  ;;  %v3087_v8 = vld [vmem:[#allocation62_spill] sm:$0xff] }
 0x176   :  { %v1463_v50 = vmul.f32 0.16666667, %v1439_v59  ;;  %867 = vst [vmem:[#allocation2 + $0x150] sm:$0xff] %v842_v13  ;;  %v648_v1 = vadd.f32 %v3077_v32, %v3076_v27  ;;  %v649_v24 = vadd.f32 %v3079_v21, %v3078_v54  ;;  %v678_v35 = vmul.f32 %v1948_v38, %v279_v55 }
 0x177   :  { %v679_v30 = vmul.f32 %v1950_v39, %v279_v55  ;;  %868 = vst [vmem:[#allocation2 + $0x158] sm:$0xff] %v843_v6  ;;  %v333_v47 = vadd.f32 %v309_v49, %v231_v53  ;;  %v334_v0 = vadd.f32 %v310_v45, %v232_v3  ;;  %v958_v43 = vadd.f32 %v3081_v36, %v3080_v44 }
 0x178   :  { %v959_v10 = vadd.f32 %v3083_v7, %v3082_v60  ;;  %1177 = vst [vmem:[#allocation2 + $0x210] sm:$0xff] %v1152_v58  ;;  %v702_v46 = vadd.f32 %v678_v35, %v648_v1  ;;  %v988_v29 = vmul.f32 %v2188_v9, %v279_v55  ;;  %v989_v61 = vmul.f32 %v2192_v18, %v279_v55 }
 0x179   :  { %v703_v42 = vadd.f32 %v679_v30, %v649_v24  ;;  %1178 = vst [vmem:[#allocation2 + $0x218] sm:$0xff] %v1153_v17  ;;  %v417_v33 = vadd.f32 %v393_v22, %v333_v47  ;;  %v418_v19 = vadd.f32 %v393_v22, %v334_v0  ;;  %v1268_v41 = vadd.f32 %v3085_v48, %v3084_v40  ;;  %v3090_v40 = vld [vmem:[#allocation37_spill] sm:$0xff]  ;;  %v3091_v48 = vld [vmem:[#allocation88_spill] sm:$0xff] }
 0x17a   :  { %v1269_v12 = vadd.f32 %v3087_v8, %v3086_v16  ;;  %1487 = vst [vmem:[#allocation2 + $0x2d0] sm:$0xff] %v1462_v15  ;;  %v726_v31 = vadd.f32 %v702_v46, %v393_v22  ;;  %v1012_v57 = vadd.f32 %v988_v29, %v958_v43  ;;  %v1013_v4 = vadd.f32 %v989_v61, %v959_v10  ;;  %v348_v46 = vpop.permute.xlu1 %347  ;;  %v3088_v61 = vld [vmem:[#allocation36_spill] sm:$0xff] }
 0x17b   :  { %v727_v11 = vadd.f32 %v703_v42, %v393_v22  ;;  %1488 = vst [vmem:[#allocation2 + $0x2d8] sm:$0xff] %v1463_v50  ;;  %v441_v2 = vadd.f32 3.0, %v417_v33  ;;  %v442_v25 = vadd.f32 3.0, %v418_v19  ;;  %v1298_v28 = vmul.f32 %v3070_v56, %v279_v55 }
 0x17c   :  { %v1299_v51 = vmul.f32 %v3071_v14, %v279_v55  ;;  %v750_v63 = vadd.f32 3.0, %v726_v31  ;;  %v1036_v13 = vadd.f32 %v1012_v57, %v393_v22  ;;  %v1037_v6 = vadd.f32 %v1013_v4, %v393_v22  ;;  %v3094_v57 = vld [vmem:[#allocation39_spill] sm:$0xff]  ;;  %v3095_v4 = vld [vmem:[#allocation90_spill] sm:$0xff] }
 0x17d   :  { %v751_v20 = vadd.f32 3.0, %v727_v11  ;;  %v465_v62 = vmax.f32 %v441_v2, 0.0  ;;  %v466_v59 = vmax.f32 %v442_v25, 0.0  ;;  %v1322_v58 = vadd.f32 %v1298_v28, %v1268_v41 }
 0x17e   :  { %v1323_v17 = vadd.f32 %v1299_v51, %v1269_v12  ;;  %v774_v34 = vmax.f32 %v750_v63, 0.0  ;;  %v1060_v53 = vadd.f32 3.0, %v1036_v13  ;;  %v1061_v5 = vadd.f32 3.0, %v1037_v6  ;;  %v3092_v12 = vld [vmem:[#allocation38_spill] sm:$0xff] }
 0x17f   :  { %v775_v52 = vmax.f32 %v751_v20, 0.0  ;;  %v489_v26 = vmin.f32 %v465_v62, 6.0  ;;  %v490_v3 = vmin.f32 %v466_v59, 6.0  ;;  %v1346_v15 = vadd.f32 %v1322_v58, %v393_v22  ;;  %v3097_v62 = vld [vmem:[#allocation91_spill] sm:$0xff]  ;;  %v3098_v58 = vld [vmem:[#allocation41_spill] sm:$0xff] }
 0x180   :  { %v1347_v50 = vadd.f32 %v1323_v17, %v393_v22  ;;  %v798_v49 = vmin.f32 %v774_v34, 6.0  ;;  %v1084_v27 = vmax.f32 %v1060_v53, 0.0  ;;  %v1085_v55 = vmax.f32 %v1061_v5, 0.0  ;;  %v3099_v17 = vld [vmem:[#allocation92_spill] sm:$0xff] }
 0x181   :  { %v799_v45 = vmin.f32 %v775_v52, 6.0  ;;  %v513_v32 = vmul.f32 %v489_v26, %v417_v33  ;;  %v514_v1 = vmul.f32 %v490_v3, %v418_v19  ;;  %v1370_v54 = vadd.f32 3.0, %v1346_v15  ;;  %v3089_v33 = vld [vmem:[#allocation87_spill] sm:$0xff]  ;;  %v3100_v26 = vld [vmem:[#allocation42_spill] sm:$0xff]  ;;  %v3101_v3 = vld [vmem:[#allocation93_spill] sm:$0xff] }
 0x182   :  { %v1371_v21 = vadd.f32 3.0, %v1347_v50  ;;  %v822_v24 = vmul.f32 %v798_v49, %v726_v31  ;;  %v1108_v30 = vmin.f32 %v1084_v27, 6.0  ;;  %v1109_v47 = vmin.f32 %v1085_v55, 6.0  ;;  %v3093_v31 = vld [vmem:[#allocation89_spill] sm:$0xff] }
 0x183   :  { %v823_v35 = vmul.f32 %v799_v45, %v727_v11  ;;  %v537_v0 = vmul.f32 0.16666667, %v513_v32  ;;  %v538_v44 = vmul.f32 0.16666667, %v514_v1  ;;  %v1394_v36 = vmax.f32 %v1370_v54, 0.0  ;;  %v3102_v1 = vld [vmem:[#allocation43_spill] sm:$0xff] }
 0x184   :  { %v1395_v43 = vmax.f32 %v1371_v21, 0.0  ;;  %v846_v60 = vmul.f32 0.16666667, %v822_v24  ;;  %v1132_v10 = vmul.f32 %v1108_v30, %v1036_v13  ;;  %v1133_v22 = vmul.f32 %v1109_v47, %v1037_v6  ;;  %v3096_v6 = vld [vmem:[#allocation40_spill] sm:$0xff]  ;;  %v3103_v54 = vld [vmem:[#allocation94_spill] sm:$0xff] }
 0x185   :  { %v847_v7 = vmul.f32 0.16666667, %v823_v35  ;;  %561 = vst [vmem:[#allocation2 + $0xb0] sm:$0xff] %v537_v0  ;;  %v1418_v42 = vmin.f32 %v1394_v36, 6.0  ;;  %v315_v19 = vadd.f32 %v3089_v33, %v3088_v61  ;;  %v316_v41 = vadd.f32 %v3091_v48, %v3090_v40 }
 0x186   :  { %v1419_v29 = vmin.f32 %v1395_v43, 6.0  ;;  %562 = vst [vmem:[#allocation2 + $0xb8] sm:$0xff] %v538_v44  ;;  %v1156_v16 = vmul.f32 0.16666667, %v1132_v10  ;;  %v1157_v8 = vmul.f32 0.16666667, %v1133_v22  ;;  %v684_v11 = vadd.f32 %v3093_v31, %v3092_v12 }
 0x187   :  { %v685_v2 = vadd.f32 %v3095_v4, %v3094_v57  ;;  %871 = vst [vmem:[#allocation2 + $0x170] sm:$0xff] %v846_v60  ;;  %v1442_v25 = vmul.f32 %v1418_v42, %v1346_v15  ;;  %v399_v51 = vadd.f32 %v348_v46, %v315_v19  ;;  %v400_v63 = vadd.f32 %v348_v46, %v316_v41 }
 0x188   :  { %v1443_v28 = vmul.f32 %v1419_v29, %v1347_v50  ;;  %872 = vst [vmem:[#allocation2 + $0x178] sm:$0xff] %v847_v7  ;;  %v708_v20 = vadd.f32 %v684_v11, %v348_v46  ;;  %v994_v59 = vadd.f32 %v3097_v62, %v3096_v6  ;;  %v995_v34 = vadd.f32 %v3099_v17, %v3098_v58  ;;  %v3105_v62 = vld [vmem:[#allocation119_spill] sm:$0xff]  ;;  %v358_v58 = vpop.permute.xlu1 %357 }
 0x189   :  { %v709_v13 = vadd.f32 %v685_v2, %v348_v46  ;;  %1181 = vst [vmem:[#allocation2 + $0x230] sm:$0xff] %v1156_v16  ;;  %v1466_v52 = vmul.f32 0.16666667, %v1442_v25  ;;  %v423_v5 = vadd.f32 3.0, %v399_v51  ;;  %v1304_v49 = vadd.f32 %v3101_v3, %v3100_v26  ;;  %v3111_v26 = vld [vmem:[#allocation122_spill] sm:$0xff] }
 0x18a   :  { %v1467_v53 = vmul.f32 0.16666667, %v1443_v28  ;;  %1182 = vst [vmem:[#allocation2 + $0x238] sm:$0xff] %v1157_v8  ;;  %v424_v15 = vadd.f32 3.0, %v400_v63  ;;  %v732_v50 = vadd.f32 3.0, %v708_v20  ;;  %v1018_v27 = vadd.f32 %v994_v59, %v348_v46 }
 0x18b   :  { %v733_v45 = vadd.f32 3.0, %v709_v13  ;;  %1491 = vst [vmem:[#allocation2 + $0x2f0] sm:$0xff] %v1466_v52  ;;  %v447_v55 = vmax.f32 %v423_v5, 0.0  ;;  %v1019_v32 = vadd.f32 %v995_v34, %v348_v46  ;;  %v1305_v21 = vadd.f32 %v3103_v54, %v3102_v1  ;;  %v3108_v34 = vld [vmem:[#allocation54_spill] sm:$0xff]  ;;  %v3109_v52 = vld [vmem:[#allocation121_spill] sm:$0xff]  ;;  %v3110_v5 = vld [vmem:[#allocation55_spill] sm:$0xff] }
 0x18c   :  { %v1328_v24 = vadd.f32 %v1304_v49, %v348_v46  ;;  %1492 = vst [vmem:[#allocation2 + $0x2f8] sm:$0xff] %v1467_v53  ;;  %v448_v35 = vmax.f32 %v424_v15, 0.0  ;;  %v756_v30 = vmax.f32 %v732_v50, 0.0  ;;  %v1042_v0 = vadd.f32 3.0, %v1018_v27  ;;  %v3115_v1 = vld [vmem:[#allocation132_spill] sm:$0xff] }
 0x18d   :  { %v757_v47 = vmax.f32 %v733_v45, 0.0  ;;  %v471_v44 = vmin.f32 %v447_v55, 6.0  ;;  %v1043_v36 = vadd.f32 3.0, %v1019_v32  ;;  %v1329_v43 = vadd.f32 %v1305_v21, %v348_v46  ;;  %v3112_v45 = vld [vmem:[#allocation56_spill] sm:$0xff]  ;;  %v3116_v21 = vld [vmem:[#allocation58_spill] sm:$0xff] }
 0x18e   :  { %v1352_v60 = vadd.f32 3.0, %v1328_v24  ;;  %v472_v7 = vmin.f32 %v448_v35, 6.0  ;;  %v780_v10 = vmin.f32 %v756_v30, 6.0  ;;  %v1066_v42 = vmax.f32 %v1042_v0, 0.0  ;;  %v3118_v30 = vld [vmem:[#allocation11_spill] sm:$0xff] }
 0x18f   :  { %v781_v22 = vmin.f32 %v757_v47, 6.0  ;;  %v495_v29 = vmul.f32 %v471_v44, %v399_v51  ;;  %v1067_v61 = vmax.f32 %v1043_v36, 0.0  ;;  %v1353_v33 = vadd.f32 3.0, %v1329_v43  ;;  %v3104_v51 = vld [vmem:[#allocation52_spill] sm:$0xff]  ;;  %v3119_v47 = vld [vmem:[#allocation134_spill] sm:$0xff] }
 0x190   :  { %v1376_v19 = vmax.f32 %v1352_v60, 0.0  ;;  %v496_v40 = vmul.f32 %v472_v7, %v400_v63  ;;  %v804_v48 = vmul.f32 %v780_v10, %v708_v20  ;;  %v1090_v16 = vmin.f32 %v1066_v42, 6.0  ;;  %v3106_v20 = vld [vmem:[#allocation53_spill] sm:$0xff] }
 0x191   :  { %v805_v41 = vmul.f32 %v781_v22, %v709_v13  ;;  %v519_v8 = vmul.f32 0.16666667, %v495_v29  ;;  %v1091_v12 = vmin.f32 %v1067_v61, 6.0  ;;  %v1377_v31 = vmax.f32 %v1353_v33, 0.0  ;;  %v3107_v13 = vld [vmem:[#allocation120_spill] sm:$0xff] }
 0x192   :  { %v1400_v11 = vmin.f32 %v1376_v19, 6.0  ;;  %v520_v57 = vmul.f32 0.16666667, %v496_v40  ;;  %v828_v4 = vmul.f32 0.16666667, %v804_v48  ;;  %v1114_v2 = vmul.f32 %v1090_v16, %v1018_v27  ;;  %v3113_v27 = vld [vmem:[#allocation131_spill] sm:$0xff] }
 0x193   :  { %v829_v46 = vmul.f32 0.16666667, %v805_v41  ;;  %543 = vst [vmem:[#allocation2 + $0x20] sm:$0xff] %v519_v8  ;;  %v1115_v25 = vmul.f32 %v1091_v12, %v1019_v32  ;;  %v1401_v28 = vmin.f32 %v1377_v31, 6.0  ;;  %v319_v59 = vadd.f32 %v3105_v62, %v3104_v51  ;;  %v3114_v32 = vld [vmem:[#allocation57_spill] sm:$0xff] }
 0x194   :  { %v1424_v6 = vmul.f32 %v1400_v11, %v1328_v24  ;;  %544 = vst [vmem:[#allocation2 + $0x28] sm:$0xff] %v520_v57  ;;  %v1138_v63 = vmul.f32 0.16666667, %v1114_v2  ;;  %v320_v17 = vadd.f32 %v3107_v13, %v3106_v20  ;;  %v688_v53 = vadd.f32 %v3109_v52, %v3108_v34  ;;  %v3117_v24 = vld [vmem:[#allocation133_spill] sm:$0xff] }
 0x195   :  { %v689_v3 = vadd.f32 %v3111_v26, %v3110_v5  ;;  %853 = vst [vmem:[#allocation2 + $0xe0] sm:$0xff] %v828_v4  ;;  %v1139_v49 = vmul.f32 0.16666667, %v1115_v25  ;;  %v1425_v15 = vmul.f32 %v1401_v28, %v1329_v43  ;;  %v998_v55 = vadd.f32 %v3113_v27, %v3112_v45  ;;  %v373_v27 = vpop.permute.xlu1 %372 }
 0x196   :  { %v1448_v50 = vmul.f32 0.16666667, %v1424_v6  ;;  %854 = vst [vmem:[#allocation2 + $0xe8] sm:$0xff] %v829_v46  ;;  %v999_v54 = vadd.f32 %v3115_v1, %v3114_v32  ;;  %v1308_v35 = vadd.f32 %v3117_v24, %v3116_v21  ;;  %v1309_v0 = vadd.f32 %v3119_v47, %v3118_v30  ;;  %v3120_v1 = vld [vmem:[#allocation63_spill] sm:$0xff]  ;;  %v3122_v24 = vld [vmem:[#allocation64_spill] sm:$0xff] }
 0x197   :  { %v403_v44 = vadd.f32 %v358_v58, %v319_v59  ;;  %1163 = vst [vmem:[#allocation2 + $0x1a0] sm:$0xff] %v1138_v63  ;;  %v1449_v36 = vmul.f32 0.16666667, %v1425_v15  ;;  %v404_v60 = vadd.f32 %v358_v58, %v320_v17  ;;  %v712_v7 = vadd.f32 %v688_v53, %v358_v58 }
 0x198   :  { %v713_v43 = vadd.f32 %v689_v3, %v358_v58  ;;  %1164 = vst [vmem:[#allocation2 + $0x1a8] sm:$0xff] %v1139_v49  ;;  %v1022_v22 = vadd.f32 %v998_v55, %v358_v58  ;;  %v1023_v42 = vadd.f32 %v999_v54, %v358_v58  ;;  %v1332_v29 = vadd.f32 %v1308_v35, %v358_v58  ;;  %v3121_v54 = vld [vmem:[#allocation103_spill] sm:$0xff]  ;;  %v3123_v35 = vld [vmem:[#allocation104_spill] sm:$0xff] }
 0x199   :  { %v427_v10 = vadd.f32 3.0, %v403_v44  ;;  %1473 = vst [vmem:[#allocation2 + $0x260] sm:$0xff] %v1448_v50  ;;  %v428_v61 = vadd.f32 3.0, %v404_v60  ;;  %v736_v33 = vadd.f32 3.0, %v712_v7  ;;  %v1333_v40 = vadd.f32 %v1309_v0, %v358_v58 }
 0x19a   :  { %v737_v19 = vadd.f32 3.0, %v713_v43  ;;  %1474 = vst [vmem:[#allocation2 + $0x268] sm:$0xff] %v1449_v36  ;;  %v1046_v41 = vadd.f32 3.0, %v1022_v22  ;;  %v1047_v16 = vadd.f32 3.0, %v1023_v42  ;;  %v1356_v8 = vadd.f32 3.0, %v1332_v29  ;;  %v3125_v36 = vld [vmem:[#allocation105_spill] sm:$0xff] }
 0x19b   :  { %v451_v48 = vmax.f32 %v427_v10, 0.0  ;;  %v452_v12 = vmax.f32 %v428_v61, 0.0  ;;  %v760_v31 = vmax.f32 %v736_v33, 0.0  ;;  %v1357_v57 = vadd.f32 3.0, %v1333_v40  ;;  %v3129_v61 = vld [vmem:[#allocation107_spill] sm:$0xff] }
 0x19c   :  { %v761_v11 = vmax.f32 %v737_v19, 0.0  ;;  %v1070_v46 = vmax.f32 %v1046_v41, 0.0  ;;  %v1071_v2 = vmax.f32 %v1047_v16, 0.0  ;;  %v1380_v25 = vmax.f32 %v1356_v8, 0.0  ;;  %v3130_v19 = vld [vmem:[#allocation68_spill] sm:$0xff]  ;;  %v3132_v8 = vld [vmem:[#allocation69_spill] sm:$0xff] }
 0x19d   :  { %v475_v4 = vmin.f32 %v451_v48, 6.0  ;;  %v476_v28 = vmin.f32 %v452_v12, 6.0  ;;  %v784_v6 = vmin.f32 %v760_v31, 6.0  ;;  %v1381_v62 = vmax.f32 %v1357_v57, 0.0  ;;  %v3133_v12 = vld [vmem:[#allocation109_spill] sm:$0xff]  ;;  %v3135_v57 = vld [vmem:[#allocation110_spill] sm:$0xff] }
 0x19e   :  { %v785_v51 = vmin.f32 %v761_v11, 6.0  ;;  %v1094_v63 = vmin.f32 %v1070_v46, 6.0  ;;  %v1095_v58 = vmin.f32 %v1071_v2, 6.0  ;;  %v1404_v20 = vmin.f32 %v1380_v25, 6.0  ;;  %v3134_v11 = vld [vmem:[#allocation70_spill] sm:$0xff] }
 0x19f   :  { %v499_v59 = vmul.f32 %v475_v4, %v403_v44  ;;  %v500_v13 = vmul.f32 %v476_v28, %v404_v60  ;;  %v808_v17 = vmul.f32 %v784_v6, %v712_v7  ;;  %v1405_v52 = vmin.f32 %v1381_v62, 6.0  ;;  %v3124_v44 = vld [vmem:[#allocation65_spill] sm:$0xff]  ;;  %v3126_v7 = vld [vmem:[#allocation66_spill] sm:$0xff] }
 0x1a0   :  { %v809_v34 = vmul.f32 %v785_v51, %v713_v43  ;;  %v1118_v5 = vmul.f32 %v1094_v63, %v1022_v22  ;;  %v1119_v26 = vmul.f32 %v1095_v58, %v1023_v42  ;;  %v1428_v3 = vmul.f32 %v1404_v20, %v1332_v29  ;;  %v3127_v43 = vld [vmem:[#allocation106_spill] sm:$0xff]  ;;  %v3128_v29 = vld [vmem:[#allocation67_spill] sm:$0xff] }
 0x1a1   :  { %v523_v53 = vmul.f32 0.16666667, %v499_v59  ;;  %v524_v49 = vmul.f32 0.16666667, %v500_v13  ;;  %v832_v15 = vmul.f32 0.16666667, %v808_v17  ;;  %v1429_v45 = vmul.f32 %v1405_v52, %v1333_v40 }
 0x1a2   :  { %v833_v50 = vmul.f32 0.16666667, %v809_v34  ;;  %v1142_v55 = vmul.f32 0.16666667, %v1118_v5  ;;  %v1143_v32 = vmul.f32 0.16666667, %v1119_v26  ;;  %v325_v21 = vadd.f32 %v3121_v54, %v3120_v1 }
 0x1a3   :  { %547 = vst [vmem:[#allocation2 + $0x40] sm:$0xff] %v523_v53  ;;  %v326_v30 = vadd.f32 %v3123_v35, %v3122_v24  ;;  %v1452_v47 = vmul.f32 0.16666667, %v1428_v3  ;;  %v1453_v0 = vmul.f32 0.16666667, %v1429_v45  ;;  %v694_v60 = vadd.f32 %v3125_v36, %v3124_v44  ;;  %v3131_v40 = vld [vmem:[#allocation108_spill] sm:$0xff] }
 0x1a4   :  { %548 = vst [vmem:[#allocation2 + $0x48] sm:$0xff] %v524_v49  ;;  %v695_v10 = vadd.f32 %v3127_v43, %v3126_v7  ;;  %v409_v22 = vadd.f32 %v373_v27, %v325_v21  ;;  %v1004_v33 = vadd.f32 %v3129_v61, %v3128_v29  ;;  %v1005_v48 = vadd.f32 %v3131_v40, %v3130_v19  ;;  %v3138_v19 = vld [vmem:[#allocation80_spill] sm:$0xff] }
 0x1a5   :  { %857 = vst [vmem:[#allocation2 + $0x100] sm:$0xff] %v832_v15  ;;  %v410_v42 = vadd.f32 %v373_v27, %v326_v30  ;;  %v718_v41 = vadd.f32 %v694_v60, %v373_v27  ;;  %v1314_v31 = vadd.f32 %v3133_v12, %v3132_v8  ;;  %v1315_v4 = vadd.f32 %v3135_v57, %v3134_v11  ;;  %v3139_v40 = vld [vmem:[#allocation72_spill] sm:$0xff]  ;;  %v3140_v8 = vld [vmem:[#allocation81_spill] sm:$0xff]  ;;  %v3142_v11 = vld [vmem:[#allocation82_spill] sm:$0xff] }
 0x1a6   :  { %858 = vst [vmem:[#allocation2 + $0x108] sm:$0xff] %v833_v50  ;;  %v719_v16 = vadd.f32 %v695_v10, %v373_v27  ;;  %v433_v46 = vadd.f32 3.0, %v409_v22  ;;  %v1028_v25 = vadd.f32 %v1004_v33, %v373_v27  ;;  %v1029_v28 = vadd.f32 %v1005_v48, %v373_v27  ;;  %v3136_v33 = vld [vmem:[#allocation79_spill] sm:$0xff]  ;;  %v3141_v12 = vld [vmem:[#allocation73_spill] sm:$0xff]  ;;  %v3143_v57 = vld [vmem:[#allocation74_spill] sm:$0xff] }
 0x1a7   :  { %1167 = vst [vmem:[#allocation2 + $0x1c0] sm:$0xff] %v1142_v55  ;;  %v434_v2 = vadd.f32 3.0, %v410_v42  ;;  %v742_v6 = vadd.f32 3.0, %v718_v41  ;;  %v1338_v62 = vadd.f32 %v1314_v31, %v373_v27  ;;  %v1339_v59 = vadd.f32 %v1315_v4, %v373_v27 }
 0x1a8   :  { %1168 = vst [vmem:[#allocation2 + $0x1c8] sm:$0xff] %v1143_v32  ;;  %v743_v51 = vadd.f32 3.0, %v719_v16  ;;  %v457_v63 = vmax.f32 %v433_v46, 0.0  ;;  %v1052_v20 = vadd.f32 3.0, %v1028_v25  ;;  %v1053_v13 = vadd.f32 3.0, %v1029_v28  ;;  %v3144_v46 = vld [vmem:[#allocation83_spill] sm:$0xff] }
 0x1a9   :  { %1477 = vst [vmem:[#allocation2 + $0x280] sm:$0xff] %v1452_v47  ;;  %v458_v58 = vmax.f32 %v434_v2, 0.0  ;;  %v766_v17 = vmax.f32 %v742_v6, 0.0  ;;  %v1362_v52 = vadd.f32 3.0, %v1338_v62  ;;  %v1363_v53 = vadd.f32 3.0, %v1339_v59  ;;  %v3145_v2 = vld [vmem:[#allocation75_spill] sm:$0xff] }
 0x1aa   :  { %1478 = vst [vmem:[#allocation2 + $0x288] sm:$0xff] %v1453_v0  ;;  %v767_v34 = vmax.f32 %v743_v51, 0.0  ;;  %v481_v5 = vmin.f32 %v457_v63, 6.0  ;;  %v1076_v3 = vmax.f32 %v1052_v20, 0.0  ;;  %v1077_v49 = vmax.f32 %v1053_v13, 0.0  ;;  %v3147_v6 = vld [vmem:[#allocation76_spill] sm:$0xff] }
 0x1ab   :  { %v482_v26 = vmin.f32 %v458_v58, 6.0  ;;  %v790_v15 = vmin.f32 %v766_v17, 6.0  ;;  %v1386_v45 = vmax.f32 %v1362_v52, 0.0  ;;  %v1387_v55 = vmax.f32 %v1363_v53, 0.0  ;;  %v3150_v58 = vld [vmem:[#allocation86_spill] sm:$0xff] }
 0x1ac   :  { %v791_v50 = vmin.f32 %v767_v34, 6.0  ;;  %v505_v32 = vmul.f32 %v481_v5, %v409_v22  ;;  %v1100_v1 = vmin.f32 %v1076_v3, 6.0  ;;  %v1101_v54 = vmin.f32 %v1077_v49, 6.0  ;;  %v3137_v22 = vld [vmem:[#allocation71_spill] sm:$0xff]  ;;  %v3151_v20 = vld [vmem:[#allocation78_spill] sm:$0xff] }
 0x1ad   :  { %v506_v27 = vmul.f32 %v482_v26, %v410_v42  ;;  %v814_v21 = vmul.f32 %v790_v15, %v718_v41  ;;  %v1410_v35 = vmin.f32 %v1386_v45, 6.0  ;;  %v1411_v30 = vmin.f32 %v1387_v55, 6.0  ;;  %v3152_v17 = vld [vmem:[#allocation102_spill] sm:$0xff]  ;;  %v388_v26 = vpop.permute.xlu1 %387 }
 0x1ae   :  { %v815_v24 = vmul.f32 %v791_v50, %v719_v16  ;;  %v529_v47 = vmul.f32 0.16666667, %v505_v32  ;;  %v1124_v44 = vmul.f32 %v1100_v1, %v1028_v25  ;;  %v1125_v36 = vmul.f32 %v1101_v54, %v1029_v28  ;;  %v3146_v28 = vld [vmem:[#allocation84_spill] sm:$0xff] }
 0x1af   :  { %v530_v0 = vmul.f32 0.16666667, %v506_v27  ;;  %v838_v60 = vmul.f32 0.16666667, %v814_v21  ;;  %v1434_v43 = vmul.f32 %v1410_v35, %v1338_v62  ;;  %v1435_v10 = vmul.f32 %v1411_v30, %v1339_v59  ;;  %v3148_v62 = vld [vmem:[#allocation85_spill] sm:$0xff] }
 0x1b0   :  { %v839_v7 = vmul.f32 0.16666667, %v815_v24  ;;  %553 = vst [vmem:[#allocation2 + $0x70] sm:$0xff] %v529_v47  ;;  %v1148_v29 = vmul.f32 0.16666667, %v1124_v44  ;;  %v229_v42 = vadd.f32 %v3137_v22, %v3136_v33  ;;  %v230_v48 = vadd.f32 %v3139_v40, %v3138_v19  ;;  %v3149_v59 = vld [vmem:[#allocation77_spill] sm:$0xff] }
 0x1b1   :  { %v1149_v61 = vmul.f32 0.16666667, %v1125_v36  ;;  %554 = vst [vmem:[#allocation2 + $0x78] sm:$0xff] %v530_v0  ;;  %v1458_v41 = vmul.f32 0.16666667, %v1434_v43  ;;  %v646_v31 = vadd.f32 %v3141_v12, %v3140_v8  ;;  %v647_v4 = vadd.f32 %v3143_v57, %v3142_v11 }
 0x1b2   :  { %v1459_v16 = vmul.f32 0.16666667, %v1435_v10  ;;  %863 = vst [vmem:[#allocation2 + $0x130] sm:$0xff] %v838_v60  ;;  %v956_v25 = vadd.f32 %v3145_v2, %v3144_v46  ;;  %v957_v51 = vadd.f32 %v3147_v6, %v3146_v28  ;;  %v1266_v63 = vadd.f32 %v3149_v59, %v3148_v62 }
 0x1b3   :  { %v1267_v13 = vadd.f32 %v3151_v20, %v3150_v58  ;;  %864 = vst [vmem:[#allocation2 + $0x138] sm:$0xff] %v839_v7  ;;  %v307_v34 = vmul.f32 %v1944_v23, %v3152_v17  ;;  %v308_v52 = vmul.f32 %v1946_v37, %v3152_v17  ;;  %v676_v53 = vmul.f32 %v1948_v38, %v3152_v17 }
 0x1b4   :  { %v677_v5 = vmul.f32 %v1950_v39, %v3152_v17  ;;  %1173 = vst [vmem:[#allocation2 + $0x1f0] sm:$0xff] %v1148_v29  ;;  %v986_v3 = vmul.f32 %v2188_v9, %v3152_v17  ;;  %v987_v49 = vmul.f32 %v2192_v18, %v3152_v17  ;;  %v1296_v23 = vmul.f32 %v3070_v56, %v3152_v17 }
 0x1b5   :  { %v1297_v37 = vmul.f32 %v3071_v14, %v3152_v17  ;;  %1174 = vst [vmem:[#allocation2 + $0x1f8] sm:$0xff] %v1149_v61  ;;  %v331_v15 = vadd.f32 %v307_v34, %v229_v42  ;;  %v332_v38 = vadd.f32 %v308_v52, %v230_v48  ;;  %v700_v50 = vadd.f32 %v676_v53, %v646_v31 }
 0x1b6   :  { %v701_v45 = vadd.f32 %v677_v5, %v647_v4  ;;  %1483 = vst [vmem:[#allocation2 + $0x2b0] sm:$0xff] %v1458_v41  ;;  %v1010_v39 = vadd.f32 %v986_v3, %v956_v25  ;;  %v1011_v55 = vadd.f32 %v987_v49, %v957_v51  ;;  %v1320_v32 = vadd.f32 %v1296_v23, %v1266_v63 }
 0x1b7   :  { %v1321_v27 = vadd.f32 %v1297_v37, %v1267_v13  ;;  %1484 = vst [vmem:[#allocation2 + $0x2b8] sm:$0xff] %v1459_v16  ;;  %v415_v9 = vadd.f32 %v388_v26, %v331_v15  ;;  %v416_v1 = vadd.f32 %v388_v26, %v332_v38  ;;  %v724_v18 = vadd.f32 %v700_v50, %v388_v26 }
 0x1b8   :  { %v725_v54 = vadd.f32 %v701_v45, %v388_v26  ;;  %v1034_v21 = vadd.f32 %v1010_v39, %v388_v26  ;;  %v1035_v56 = vadd.f32 %v1011_v55, %v388_v26  ;;  %v1344_v24 = vadd.f32 %v1320_v32, %v388_v26 }
 0x1b9   :  { %v1345_v35 = vadd.f32 %v1321_v27, %v388_v26  ;;  %v439_v14 = vadd.f32 3.0, %v415_v9  ;;  %v440_v30 = vadd.f32 3.0, %v416_v1  ;;  %v748_v47 = vadd.f32 3.0, %v724_v18 }
 0x1ba   :  { %v749_v0 = vadd.f32 3.0, %v725_v54  ;;  %v1058_v44 = vadd.f32 3.0, %v1034_v21  ;;  %v1059_v36 = vadd.f32 3.0, %v1035_v56  ;;  %v1368_v60 = vadd.f32 3.0, %v1344_v24 }
 0x1bb   :  { %v1369_v7 = vadd.f32 3.0, %v1345_v35  ;;  %v463_v43 = vmax.f32 %v439_v14, 0.0  ;;  %v464_v10 = vmax.f32 %v440_v30, 0.0  ;;  %v772_v29 = vmax.f32 %v748_v47, 0.0 }
 0x1bc   :  { %v773_v61 = vmax.f32 %v749_v0, 0.0  ;;  %v1082_v33 = vmax.f32 %v1058_v44, 0.0  ;;  %v1083_v22 = vmax.f32 %v1059_v36, 0.0  ;;  %v1392_v42 = vmax.f32 %v1368_v60, 0.0 }
 0x1bd   :  { %v1393_v19 = vmax.f32 %v1369_v7, 0.0  ;;  %v487_v40 = vmin.f32 %v463_v43, 6.0  ;;  %v488_v48 = vmin.f32 %v464_v10, 6.0  ;;  %v796_v41 = vmin.f32 %v772_v29, 6.0 }
 0x1be   :  { %v797_v16 = vmin.f32 %v773_v61, 6.0  ;;  %v1106_v8 = vmin.f32 %v1082_v33, 6.0  ;;  %v1107_v12 = vmin.f32 %v1083_v22, 6.0  ;;  %v1416_v31 = vmin.f32 %v1392_v42, 6.0 }
 0x1bf   :  { %v1417_v11 = vmin.f32 %v1393_v19, 6.0  ;;  %v511_v57 = vmul.f32 %v487_v40, %v415_v9  ;;  %v512_v4 = vmul.f32 %v488_v48, %v416_v1  ;;  %v820_v46 = vmul.f32 %v796_v41, %v724_v18 }
 0x1c0   :  { %v821_v2 = vmul.f32 %v797_v16, %v725_v54  ;;  %v1130_v25 = vmul.f32 %v1106_v8, %v1034_v21  ;;  %v1131_v28 = vmul.f32 %v1107_v12, %v1035_v56  ;;  %v1440_v59 = vmul.f32 %v1416_v31, %v1344_v24 }
 0x1c1   :  { %v535_v6 = vmul.f32 0.16666667, %v511_v57  ;;  %v536_v51 = vmul.f32 0.16666667, %v512_v4  ;;  %v844_v62 = vmul.f32 0.16666667, %v820_v46  ;;  %v1441_v58 = vmul.f32 %v1417_v11, %v1345_v35 }
 0x1c2   :  { %v845_v63 = vmul.f32 0.16666667, %v821_v2  ;;  %v1154_v20 = vmul.f32 0.16666667, %v1130_v25  ;;  %v1155_v13 = vmul.f32 0.16666667, %v1131_v28 }
 0x1c3   :  { %559 = vst [vmem:[#allocation2 + $0xa0] sm:$0xff] %v535_v6  ;;  %v1464_v17 = vmul.f32 0.16666667, %v1440_v59  ;;  %v1465_v34 = vmul.f32 0.16666667, %v1441_v58 }
 0x1c4   :  { %560 = vst [vmem:[#allocation2 + $0xa8] sm:$0xff] %v536_v51 }
 0x1c5   :  { %869 = vst [vmem:[#allocation2 + $0x160] sm:$0xff] %v844_v62 }
 0x1c6   :  { %870 = vst [vmem:[#allocation2 + $0x168] sm:$0xff] %v845_v63 }
 0x1c7   :  { %1179 = vst [vmem:[#allocation2 + $0x220] sm:$0xff] %v1154_v20 }
 0x1c8   :  { %1180 = vst [vmem:[#allocation2 + $0x228] sm:$0xff] %v1155_v13 }
 0x1c9   :  { %1489 = vst [vmem:[#allocation2 + $0x2e0] sm:$0xff] %v1464_v17 }
 0x1ca   :  { %1490 = vst [vmem:[#allocation2 + $0x2e8] sm:$0xff] %v1465_v34 }
 0x1cb   :  { %1505 = dma.vmem_to_hbm [thread:$0]  %s1498_s11, 12288, %s1500_s14, [#allocation3], %s1561_s15, %s1561_s15, %s1562_s16  }
 0x1cc   :  { %1555 = dma.done.wait [#allocation3], 12288  }
 0x1cd   :  { %1556 = vsyncadd [#allocation3], 4294955008 }
 0x1ce   :  { %1510 = vsyncpa [#allocation3], 1 }

</bundles_post_ra>
